<compile_context>
chip_gen: v5e
topology: v5e:2x2
jax: 0.10.0
libtpu: 0.0.40
codegen_flags: <defaults>
</compile_context>

<pallas_src>
import functools

import jax
import jax.numpy as jnp
import numpy as np
from jax import lax
from jax.experimental import pallas as pl
from jax.experimental.pallas import tpu as pltpu


# ------------------------------ configuration ------------------------------
class Params:
    vocab_size = 50
    embedding_dimension = 16
    hidden_dimension = 16            # H ; BiLSTM output dim = 2H = 32
    n_layers = 1
    dropout = 0.0                    # eval mode -> identity
    use_char_embedding = 0           # char CNN branch disabled
    use_filter_gate = 1
    use_only_text = 0
    visual_feature_dimension = 24
    lambda_1 = 1.0


NUM_TAGS = 10
B, T, R = 2, 8, 8                    # batch, sequence length, image regions
LANE_PAD = 128                       # lane stride used when packing weight slabs


# ------------------------------ fused Pallas kernel -------------------------
def mner_fused_kernel(x_ref, aux_ref, img_ref, w8_ref, wv_ref, w2h_ref, bias_ref,
                      out_ref, u_sc, *, hidden, seq_len, batch, n_regions,
                      num_tags, lambda_1):
    H = hidden
    T_ = seq_len
    Bn = batch
    R_ = n_regions
    NT = num_tags
    f32 = jnp.float32
    eps2 = 1e-24                                     # (F.normalize eps)^2

    x = x_ref[...]                                   # (T*B, E), time-major rows
    aux = aux_ref[...]                               # (T*B, 2H + B*R)
    E = x.shape[1]

    # ---------------- phase 1: fused bidirectional LSTM ----------------
    # Fused gate lane layout (each group H wide):
    #   [i_f, i_b, f_f, f_b, o_f, o_b, g_f, g_b]
    wih_f = w8_ref[0:E, :]                           # (E, 8H)  fwd lanes filled
    wih_b = w8_ref[E:2 * E, :]                       # (E, 8H)  bwd lanes filled
    whh = w8_ref[2 * E:2 * E + 2 * H, :]             # (2H, 8H) block recurrent

    # Hoisted input projections: one MXU pass per direction, biases folded in.
    gxf = jnp.dot(x, wih_f, preferred_element_type=f32) + bias_ref[0:1, :]
    gxb = jnp.dot(x, wih_b, preferred_element_type=f32) + bias_ref[1:2, :]

    h = jnp.zeros((Bn, 2 * H), f32)                  # [h_f | h_b]
    c = jnp.zeros((Bn, 2 * H), f32)                  # [c_f | c_b]

    # Fused fwd/bwd recurrence: step k handles fwd t=k and bwd t=T-1-k with a
    # single (B,2H)x(2H,8H) matmul on the serial chain.  Fully unrolled (T=8).
    for k in range(T_):
        tb = T_ - 1 - k
        gx = gxf[k * Bn:(k + 1) * Bn, :] + gxb[tb * Bn:(tb + 1) * Bn, :]
        gates = jnp.dot(h, whh, preferred_element_type=f32) + gx     # (B, 8H)
        sg = jax.nn.sigmoid(gates[:, 0:6 * H])       # one sigmoid: i,f,o both dirs
        g = jnp.tanh(gates[:, 6 * H:8 * H])          # one tanh:    g both dirs
        i_g = sg[:, 0:2 * H]
        f_g = sg[:, 2 * H:4 * H]
        o_g = sg[:, 4 * H:6 * H]
        vm = aux[k * Bn:(k + 1) * Bn, 0:2 * H]       # [valid(t=k) | valid(t=tb)]

        # packed-sequence semantics: state frozen on padded steps
        c_new = f_g * c + i_g * g
        c = c + vm * (c_new - c)
        h_cand = o_g * jnp.tanh(c)
        h = h + vm * (h_cand - h)

        out_m = vm * h_cand                          # padded outputs are zero
        u_sc[k * Bn:(k + 1) * Bn, 0:H] = out_m[:, 0:H]
        u_sc[tb * Bn:(tb + 1) * Bn, H:2 * H] = out_m[:, H:2 * H]

    u = u_sc[...]                                    # (T*B, 2H)

    # -------- phase 2: cross attention + filter gate + projection (batched) --
    tmask = aux[:, 0:1]                              # (T*B, 1) time validity
    bmask = aux[:, 2 * H:2 * H + Bn * R_]            # (T*B, B*R) block-diag mask

    img = img_ref[...]                               # (B*R, V)
    v = (jnp.dot(img, wv_ref[...], preferred_element_type=f32)
         + bias_ref[2:3, 0:2 * H])                   # (B*R, 2H)

    # F.normalize(p=2, dim=-1) via rsqrt (EUP)
    v_n = v * lax.rsqrt(jnp.maximum(jnp.sum(v * v, axis=-1, keepdims=True), eps2))
    u_n = u * lax.rsqrt(jnp.maximum(jnp.sum(u * u, axis=-1, keepdims=True), eps2))

    # similarity for all batch items at once: rows (t,b), cols (b',r);
    # bmask zeroes cross-batch entries.
    sim = lax.dot_general(u_n, v_n, (((1,), (1,)), ((), ())),
                          preferred_element_type=f32)                # (T*B, B*R)
    s_c = jnp.maximum(sim, 0.0) * bmask
    # normalize over the time axis (= dim=2 of PyTorch's (B,R,T))
    col_ss = jnp.sum(s_c * s_c, axis=0, keepdims=True)               # (1, B*R)
    s_t = s_c * lax.rsqrt(jnp.maximum(col_ss, eps2))

    # StackedCrossAttention: softmax over regions (within the batch block);
    # masked time rows -> 0 (equivalent to the PyTorch -inf fill + NaN zeroing).
    alpha_t = lambda_1 * s_t
    amax = jnp.max(alpha_t, axis=-1, keepdims=True)
    e = jnp.exp(alpha_t - amax) * bmask
    inv_den = pl.reciprocal(jnp.sum(e, axis=-1, keepdims=True), approx=True)
    alpha = e * inv_den * tmask                                      # (T*B, B*R)
    a_v = jnp.dot(alpha, v, preferred_element_type=f32)              # (T*B, 2H)

    # FilterGate + projection, with the projection folded into the gate mix:
    #   m @ wp = u @ (wm1 @ wp) + ug @ ([wm2; wm3] @ wp)
    WU = w2h_ref[:, 0:H + NT]                        # [w_s_h | wm1 @ wp]
    WA = w2h_ref[:, LANE_PAD:LANE_PAD + 3 * H]       # [w_m_s | w_m]
    WG = w2h_ref[:, 2 * LANE_PAD:2 * LANE_PAD + NT]  # [wm2; wm3] @ wp

    up = jnp.dot(u, WU, preferred_element_type=f32)                  # (T*B, H+NT)
    gth = jnp.dot(a_v, WA, preferred_element_type=f32) + bias_ref[3:4, 0:3 * H]
    gate = jax.nn.sigmoid(jnp.concatenate([up[:, 0:H], gth[:, 0:H]], axis=1))
    th = jnp.tanh(gth[:, H:3 * H])
    ug = gate * th                                                   # (T*B, 2H)
    logits = (up[:, H:H + NT]
              + jnp.dot(ug, WG, preferred_element_type=f32)
              + bias_ref[4:5, 0:NT])                                 # (T*B, NT)

    # log-softmax(dim=-1), single lane-dense(ish) store of all B*T rows
    lmax = jnp.max(logits, axis=-1, keepdims=True)
    lse = lmax + jnp.log(jnp.sum(jnp.exp(logits - lmax), axis=-1, keepdims=True))
    out_ref[...] = logits - lse


# --------------------------------- wrapper ----------------------------------
def mner_forward_pallas(w, p, sentence, image, sentence_lens, mask):
    del sentence_lens                                # length info carried by `mask`
    H = p.hidden_dimension
    E = p.embedding_dimension
    Bn, T_ = sentence.shape
    R_, V_ = image.shape[1], image.shape[2]
    NT = NUM_TAGS

    # Embedding lookup is XLA glue; everything else runs in one Pallas kernel.
    embeds = w["word_emb"][sentence.T]                        # (T, B, E)
    x_flat = embeds.reshape(T_ * Bn, E)                       # time-major rows
    img_flat = image.reshape(Bn * R_, V_)

    # Row-aux slab: [fwd validity | bwd validity | block-diagonal batch mask]
    maskf = mask.astype(jnp.float32)                          # (B, T)
    mf = jnp.repeat(maskf.T.reshape(T_ * Bn, 1), H, axis=1)            # mask[b, t]
    mb = jnp.repeat(maskf[:, ::-1].T.reshape(T_ * Bn, 1), H, axis=1)   # mask[b, T-1-t]
    row_b = jnp.arange(T_ * Bn, dtype=jnp.int32) % Bn
    col_b = jnp.arange(Bn * R_, dtype=jnp.int32) // R_
    bmask = (row_b[:, None] == col_b[None, :]).astype(jnp.float32)     # (T*B, B*R)
    rowaux = jnp.concatenate([mf, mb, bmask], axis=1)         # (T*B, 2H + B*R)

    # LSTM weights re-laid out so the fused gate vector is
    # [i_f,i_b,f_f,f_b,o_f,o_b,g_f,g_b] (per-direction gate order is i,f,g,o).
    def perm_cols(wf, wb):
        return jnp.concatenate(
            [wf[:, 0:H], wb[:, 0:H], wf[:, H:2 * H], wb[:, H:2 * H],
             wf[:, 3 * H:4 * H], wb[:, 3 * H:4 * H],
             wf[:, 2 * H:3 * H], wb[:, 2 * H:3 * H]], axis=1)

    Z_e = jnp.zeros((E, 4 * H), jnp.float32)
    Z_h = jnp.zeros((H, 4 * H), jnp.float32)
    Z_b = jnp.zeros((1, 4 * H), jnp.float32)
    wih_f_c = perm_cols(w["wih_f"], Z_e)                      # fwd lanes only
    wih_b_c = perm_cols(Z_e, w["wih_b"])                      # bwd lanes only
    whh_c = jnp.concatenate([perm_cols(w["whh_f"], Z_h),
                             perm_cols(Z_h, w["whh_b"])], axis=0)      # (2H, 8H)
    w8_slab = jnp.concatenate([wih_f_c, wih_b_c, whh_c], axis=0)       # (2E+2H, 8H)

    # Projection folded into the gate mix; gate/mix weights packed into one slab.
    w_up = w["wm_1"] @ w["wp"]                                         # (2H, NT)
    w_ugp = jnp.concatenate([w["wm_2"], w["wm_3"]], axis=0) @ w["wp"]  # (2H, NT)
    WU = jnp.concatenate([w["wsh"], w_up], axis=1)                     # (2H, H+NT)
    WA = jnp.concatenate([w["wms"], w["wm"]], axis=1)                  # (2H, 3H)

    def pad_lanes(a, n=LANE_PAD):
        return jnp.pad(a, ((0, 0), (0, n - a.shape[1])))

    w2h_slab = jnp.concatenate(
        [pad_lanes(WU), pad_lanes(WA), pad_lanes(w_ugp)], axis=1)      # (2H, 384)

    bias_slab = jnp.concatenate(
        [perm_cols(w["b_f"], Z_b),                                     # row 0: fwd gate bias
         perm_cols(Z_b, w["b_b"]),                                     # row 1: bwd gate bias
         pad_lanes(w["bv"]),                                           # row 2: bv
         pad_lanes(jnp.concatenate([w["bms"], w["bm"]], axis=1)),      # row 3: [bms|bm]
         pad_lanes(w["bp"])], axis=0)                                  # row 4: bp

    kernel = functools.partial(
        mner_fused_kernel, hidden=H, seq_len=T_, batch=Bn,
        n_regions=R_, num_tags=NT, lambda_1=float(p.lambda_1))
    vm = pl.BlockSpec(memory_space=pltpu.MemorySpace.VMEM)

    out_flat = pl.pallas_call(
        kernel,
        out_shape=jax.ShapeDtypeStruct((T_ * Bn, NT), jnp.float32),
        in_specs=[vm] * 7,
        out_specs=vm,
        scratch_shapes=[pltpu.VMEM((T_ * Bn, 2 * H), jnp.float32)],
    )(x_flat, rowaux, img_flat, w8_slab, w["wv"], w2h_slab, bias_slab)

    # rows are time-major (t, b): reshape (not transpose) gives (T, B, num_tags)
    return out_flat.reshape(T_, Bn, NT)


# ------------------------- deterministic parameters --------------------------
def init_weights(key, p):
    E, H, V = p.embedding_dimension, p.hidden_dimension, p.visual_feature_dimension
    ks = list(jax.random.split(key, 24))

    def nrm(shape, scale=0.1):
        return jax.random.normal(ks.pop(), shape, dtype=jnp.float32) * scale

    w = {}
    w["word_emb"] = nrm((p.vocab_size, E), 0.5)
    # LSTM weights stored pre-transposed as (in_features, 4H), gate order i,f,g,o;
    # bias is b_ih + b_hh combined.
    w["wih_f"] = nrm((E, 4 * H)); w["whh_f"] = nrm((H, 4 * H)); w["b_f"] = nrm((1, 4 * H))
    w["wih_b"] = nrm((E, 4 * H)); w["whh_b"] = nrm((H, 4 * H)); w["b_b"] = nrm((1, 4 * H))
    # linear_transform
    w["wv"] = nrm((V, 2 * H)); w["bv"] = nrm((1, 2 * H))
    # FilterGate
    w["wsh"] = nrm((2 * H, H))                            # w_s_h (no bias)
    w["wms"] = nrm((2 * H, H)); w["bms"] = nrm((1, H))    # w_m_s
    w["wm"] = nrm((2 * H, 2 * H)); w["bm"] = nrm((1, 2 * H))  # w_m
    wm_full = nrm((4 * H, 2 * H))                         # w_m_ (no bias), split rows
    w["wm_1"] = wm_full[:2 * H]
    w["wm_2"] = wm_full[2 * H:3 * H]
    w["wm_3"] = wm_full[3 * H:]
    # projection
    w["wp"] = nrm((2 * H, NUM_TAGS)); w["bp"] = nrm((1, NUM_TAGS))
    return w


# ----------------------------- pure-JAX reference ----------------------------
def mner_reference(w, p, sentence, image, sentence_lens, mask):
    H = p.hidden_dimension
    eps = 1e-12
    x = w["word_emb"][sentence.T]                         # (T, B, E)
    T_, Bn, _ = x.shape
    lens = sentence_lens.reshape(Bn, 1).astype(jnp.int32)

    def run_dir(wih, whh, b, reverse):
        def step(carry, t):
            h, c = carry
            gates = x[t] @ wih + h @ whh + b
            i = jax.nn.sigmoid(gates[:, :H]); f = jax.nn.sigmoid(gates[:, H:2 * H])
            g = jnp.tanh(gates[:, 2 * H:3 * H]); o = jax.nn.sigmoid(gates[:, 3 * H:])
            c_new = f * c + i * g; h_new = o * jnp.tanh(c_new)
            valid = t < lens
            h = jnp.where(valid, h_new, h); c = jnp.where(valid, c_new, c)
            return (h, c), jnp.where(valid, h, 0.0)

        ts = jnp.arange(T_ - 1, -1, -1) if reverse else jnp.arange(T_)
        _, outs = lax.scan(step, (jnp.zeros((Bn, H)), jnp.zeros((Bn, H))), ts)
        return outs[::-1] if reverse else outs

    of = run_dir(w["wih_f"], w["whh_f"], w["b_f"], False)
    ob = run_dir(w["wih_b"], w["whh_b"], w["b_b"], True)
    u = jnp.transpose(jnp.concatenate([of, ob], -1), (1, 0, 2))   # (B, T, 2H)

    v = image @ w["wv"] + w["bv"]                         # (B, R, 2H)
    nv = v / jnp.maximum(jnp.sqrt(jnp.sum(v * v, -1, keepdims=True)), eps)
    nu = u / jnp.maximum(jnp.sqrt(jnp.sum(u * u, -1, keepdims=True)), eps)
    sim = jnp.einsum("brd,btd->brt", nv, nu)
    sc = jnp.maximum(sim, 0.0)
    s_t = sc / jnp.maximum(jnp.sqrt(jnp.sum(sc * sc, -1, keepdims=True)), eps)
    alpha = jax.nn.softmax(p.lambda_1 * s_t, axis=1) * mask[:, None, :]
    a_v = jnp.einsum("brt,brd->btd", alpha, v)

    g1 = jax.nn.sigmoid(u @ w["wsh"])
    g2 = jax.nn.sigmoid(a_v @ w["wms"] + w["bms"])
    th = jnp.tanh(a_v @ w["wm"] + w["bm"])
    ug = jnp.concatenate([g1, g2], -1) * th
    wm_full = jnp.concatenate([w["wm_1"], w["wm_2"], w["wm_3"]], axis=0)
    m = jnp.concatenate([u, ug], -1) @ wm_full
    out = jax.nn.log_softmax(m @ w["wp"] + w["bp"], axis=-1)
    return jnp.transpose(out, (1, 0, 2))


# ------------------------------------ main -----------------------------------
if __name__ == "__main__":
    p = Params()
    key = jax.random.PRNGKey(0)
    kw, ks, ki = jax.random.split(key, 3)
    weights = init_weights(kw, p)

    sentence = jax.random.randint(ks, (B, T), 0, p.vocab_size, dtype=jnp.int32)
    image = jax.random.normal(ki, (B, R, p.visual_feature_dimension), dtype=jnp.float32)
    sentence_lens = jnp.array([T, 5], dtype=jnp.int32)    # sorted desc (pack_padded)
    mask = (jnp.arange(T)[None, :] < sentence_lens[:, None]).astype(jnp.float32)
    # chars argument is unused because use_char_embedding == 0.

    fwd = jax.jit(lambda w, s, img, sl, msk: mner_forward_pallas(w, p, s, img, sl, msk))
    out = jax.block_until_ready(fwd(weights, sentence, image, sentence_lens, mask))

    ref = jax.block_until_ready(
        mner_reference(weights, p, sentence, image, sentence_lens, mask))
    np.testing.assert_allclose(np.asarray(out), np.asarray(ref), rtol=1e-3, atol=1e-3)
    assert out.shape == (T, B, NUM_TAGS)
    print("KERNEL_OK")
</pallas_src>

<mosaic_0001>
module attributes {stable_mosaic.version = 11 : i64} {
  func.func @mner_fused_kernel(%arg0: memref<16x16xf32, #tpu.memory_space<vmem>>, %arg1: memref<16x48xf32, #tpu.memory_space<vmem>>, %arg2: memref<16x24xf32, #tpu.memory_space<vmem>>, %arg3: memref<64x128xf32, #tpu.memory_space<vmem>>, %arg4: memref<24x32xf32, #tpu.memory_space<vmem>>, %arg5: memref<32x384xf32, #tpu.memory_space<vmem>>, %arg6: memref<5x128xf32, #tpu.memory_space<vmem>>, %arg7: memref<16x10xf32, #tpu.memory_space<vmem>>, %arg8: memref<16x32xf32, #tpu.memory_space<vmem>>) attributes {dimension_semantics = [], scalar_prefetch = 0 : i64, scratch_operands = 1 : i64, tpu.core_type = #tpu.core_type<tc>} {
    %c0 = arith.constant 0 : index
    %c0_0 = arith.constant 0 : index
    %0 = vector.load %arg0[%c0, %c0_0] : memref<16x16xf32, #tpu.memory_space<vmem>>, vector<16x16xf32>
    %c0_1 = arith.constant 0 : index
    %c0_2 = arith.constant 0 : index
    %1 = vector.load %arg1[%c0_1, %c0_2] : memref<16x48xf32, #tpu.memory_space<vmem>>, vector<16x48xf32>
    %c0_3 = arith.constant 0 : index
    %c0_4 = arith.constant 0 : index
    %2 = vector.load %arg3[%c0_3, %c0_4] : memref<64x128xf32, #tpu.memory_space<vmem>>, vector<16x128xf32>
    %c16 = arith.constant 16 : index
    %c0_5 = arith.constant 0 : index
    %3 = vector.load %arg3[%c16, %c0_5] : memref<64x128xf32, #tpu.memory_space<vmem>>, vector<16x128xf32>
    %c32 = arith.constant 32 : index
    %c0_6 = arith.constant 0 : index
    %4 = vector.load %arg3[%c32, %c0_6] : memref<64x128xf32, #tpu.memory_space<vmem>>, vector<32x128xf32>
    %cst = arith.constant dense<0.000000e+00> : vector<16x128xf32>
    %5 = tpu.matmul %0, %2, %cst {dimension_numbers = #tpu.dot_dimension_numbers<[1], [0], [0], [1], [0, 0, 1, 1], [], []>} : vector<16x16xf32>, vector<16x128xf32>, vector<16x128xf32> -> vector<16x128xf32>
    %c0_7 = arith.constant 0 : index
    %c0_8 = arith.constant 0 : index
    %6 = vector.load %arg6[%c0_7, %c0_8] : memref<5x128xf32, #tpu.memory_space<vmem>>, vector<1x128xf32>
    %7 = vector.broadcast %6 : vector<1x128xf32> to vector<16x128xf32>
    %8 = arith.addf %5, %7 : vector<16x128xf32>
    %cst_9 = arith.constant dense<0.000000e+00> : vector<16x128xf32>
    %9 = tpu.matmul %0, %3, %cst_9 {dimension_numbers = #tpu.dot_dimension_numbers<[1], [0], [0], [1], [0, 0, 1, 1], [], []>} : vector<16x16xf32>, vector<16x128xf32>, vector<16x128xf32> -> vector<16x128xf32>
    %c1 = arith.constant 1 : index
    %c0_10 = arith.constant 0 : index
    %10 = vector.load %arg6[%c1, %c0_10] : memref<5x128xf32, #tpu.memory_space<vmem>>, vector<1x128xf32>
    %11 = vector.broadcast %10 : vector<1x128xf32> to vector<16x128xf32>
    %12 = arith.addf %9, %11 : vector<16x128xf32>
    %cst_11 = arith.constant 0.000000e+00 : f32
    %13 = vector.broadcast %cst_11 : f32 to vector<2x32xf32>
    %cst_12 = arith.constant 0.000000e+00 : f32
    %14 = vector.broadcast %cst_12 : f32 to vector<2x32xf32>
    %15 = vector.extract_strided_slice %8 {offsets = [0, 0], sizes = [2, 128], strides = [1, 1]} : vector<16x128xf32> to vector<2x128xf32>
    %16 = vector.extract_strided_slice %12 {offsets = [14, 0], sizes = [2, 128], strides = [1, 1]} : vector<16x128xf32> to vector<2x128xf32>
    %17 = arith.addf %15, %16 : vector<2x128xf32>
    %cst_13 = arith.constant dense<0.000000e+00> : vector<2x128xf32>
    %18 = tpu.matmul %13, %4, %cst_13 {dimension_numbers = #tpu.dot_dimension_numbers<[1], [0], [0], [1], [0, 0, 1, 1], [], []>} : vector<2x32xf32>, vector<32x128xf32>, vector<2x128xf32> -> vector<2x128xf32>
    %19 = arith.addf %18, %17 : vector<2x128xf32>
    %20 = vector.extract_strided_slice %19 {offsets = [0, 0], sizes = [2, 96], strides = [1, 1]} : vector<2x128xf32> to vector<2x96xf32>
    %21 = arith.negf %20 : vector<2x96xf32>
    %22 = math.exp %21 : vector<2x96xf32>
    %cst_14 = arith.constant 1.000000e+00 : f32
    %23 = vector.broadcast %cst_14 : f32 to vector<2x96xf32>
    %24 = arith.addf %23, %22 : vector<2x96xf32>
    %25 = arith.divf %23, %24 : vector<2x96xf32>
    %26 = vector.extract_strided_slice %19 {offsets = [0, 96], sizes = [2, 32], strides = [1, 1]} : vector<2x128xf32> to vector<2x32xf32>
    %27 = math.tanh %26 : vector<2x32xf32>
    %28 = vector.extract_strided_slice %25 {offsets = [0, 0], sizes = [2, 32], strides = [1, 1]} : vector<2x96xf32> to vector<2x32xf32>
    %29 = vector.extract_strided_slice %25 {offsets = [0, 32], sizes = [2, 32], strides = [1, 1]} : vector<2x96xf32> to vector<2x32xf32>
    %30 = vector.extract_strided_slice %25 {offsets = [0, 64], sizes = [2, 32], strides = [1, 1]} : vector<2x96xf32> to vector<2x32xf32>
    %31 = vector.extract_strided_slice %1 {offsets = [0, 0], sizes = [2, 32], strides = [1, 1]} : vector<16x48xf32> to vector<2x32xf32>
    %32 = arith.mulf %29, %14 : vector<2x32xf32>
    %33 = arith.mulf %28, %27 : vector<2x32xf32>
    %34 = arith.addf %32, %33 : vector<2x32xf32>
    %35 = arith.subf %34, %14 : vector<2x32xf32>
    %36 = arith.mulf %31, %35 : vector<2x32xf32>
    %37 = arith.addf %14, %36 : vector<2x32xf32>
    %38 = math.tanh %37 : vector<2x32xf32>
    %39 = arith.mulf %30, %38 : vector<2x32xf32>
    %40 = arith.subf %39, %13 : vector<2x32xf32>
    %41 = arith.mulf %31, %40 : vector<2x32xf32>
    %42 = arith.addf %13, %41 : vector<2x32xf32>
    %43 = arith.mulf %31, %39 : vector<2x32xf32>
    %44 = vector.extract_strided_slice %43 {offsets = [0, 0], sizes = [2, 16], strides = [1, 1]} : vector<2x32xf32> to vector<2x16xf32>
    %c0_15 = arith.constant 0 : index
    %c0_16 = arith.constant 0 : index
    %45 = vector.load %arg8[%c0_15, %c0_16] : memref<16x32xf32, #tpu.memory_space<vmem>>, vector<2x16xf32>
    tpu.vector_store %arg8[%c0_15, %c0_16], %44 {strides = array<i32>} : memref<16x32xf32, #tpu.memory_space<vmem>>, vector<2x16xf32>,
    %46 = vector.extract_strided_slice %43 {offsets = [0, 16], sizes = [2, 16], strides = [1, 1]} : vector<2x32xf32> to vector<2x16xf32>
    %c14 = arith.constant 14 : index
    %c16_17 = arith.constant 16 : index
    %47 = vector.load %arg8[%c14, %c16_17] : memref<16x32xf32, #tpu.memory_space<vmem>>, vector<2x16xf32>
    tpu.vector_store %arg8[%c14, %c16_17], %46 {strides = array<i32>} : memref<16x32xf32, #tpu.memory_space<vmem>>, vector<2x16xf32>,
    %48 = vector.extract_strided_slice %8 {offsets = [2, 0], sizes = [2, 128], strides = [1, 1]} : vector<16x128xf32> to vector<2x128xf32>
    %49 = vector.extract_strided_slice %12 {offsets = [12, 0], sizes = [2, 128], strides = [1, 1]} : vector<16x128xf32> to vector<2x128xf32>
    %50 = arith.addf %48, %49 : vector<2x128xf32>
    %cst_18 = arith.constant dense<0.000000e+00> : vector<2x128xf32>
    %51 = tpu.matmul %42, %4, %cst_18 {dimension_numbers = #tpu.dot_dimension_numbers<[1], [0], [0], [1], [0, 0, 1, 1], [], []>} : vector<2x32xf32>, vector<32x128xf32>, vector<2x128xf32> -> vector<2x128xf32>
    %52 = arith.addf %51, %50 : vector<2x128xf32>
    %53 = vector.extract_strided_slice %52 {offsets = [0, 0], sizes = [2, 96], strides = [1, 1]} : vector<2x128xf32> to vector<2x96xf32>
    %54 = arith.negf %53 : vector<2x96xf32>
    %55 = math.exp %54 : vector<2x96xf32>
    %cst_19 = arith.constant 1.000000e+00 : f32
    %56 = vector.broadcast %cst_19 : f32 to vector<2x96xf32>
    %57 = arith.addf %56, %55 : vector<2x96xf32>
    %58 = arith.divf %56, %57 : vector<2x96xf32>
    %59 = vector.extract_strided_slice %52 {offsets = [0, 96], sizes = [2, 32], strides = [1, 1]} : vector<2x128xf32> to vector<2x32xf32>
    %60 = math.tanh %59 : vector<2x32xf32>
    %61 = vector.extract_strided_slice %58 {offsets = [0, 0], sizes = [2, 32], strides = [1, 1]} : vector<2x96xf32> to vector<2x32xf32>
    %62 = vector.extract_strided_slice %58 {offsets = [0, 32], sizes = [2, 32], strides = [1, 1]} : vector<2x96xf32> to vector<2x32xf32>
    %63 = vector.extract_strided_slice %58 {offsets = [0, 64], sizes = [2, 32], strides = [1, 1]} : vector<2x96xf32> to vector<2x32xf32>
    %64 = vector.extract_strided_slice %1 {offsets = [2, 0], sizes = [2, 32], strides = [1, 1]} : vector<16x48xf32> to vector<2x32xf32>
    %65 = arith.mulf %62, %37 : vector<2x32xf32>
    %66 = arith.mulf %61, %60 : vector<2x32xf32>
    %67 = arith.addf %65, %66 : vector<2x32xf32>
    %68 = arith.subf %67, %37 : vector<2x32xf32>
    %69 = arith.mulf %64, %68 : vector<2x32xf32>
    %70 = arith.addf %37, %69 : vector<2x32xf32>
    %71 = math.tanh %70 : vector<2x32xf32>
    %72 = arith.mulf %63, %71 : vector<2x32xf32>
    %73 = arith.subf %72, %42 : vector<2x32xf32>
    %74 = arith.mulf %64, %73 : vector<2x32xf32>
    %75 = arith.addf %42, %74 : vector<2x32xf32>
    %76 = arith.mulf %64, %72 : vector<2x32xf32>
    %77 = vector.extract_strided_slice %76 {offsets = [0, 0], sizes = [2, 16], strides = [1, 1]} : vector<2x32xf32> to vector<2x16xf32>
    %c2 = arith.constant 2 : index
    %c0_20 = arith.constant 0 : index
    %78 = vector.load %arg8[%c2, %c0_20] : memref<16x32xf32, #tpu.memory_space<vmem>>, vector<2x16xf32>
    tpu.vector_store %arg8[%c2, %c0_20], %77 {strides = array<i32>} : memref<16x32xf32, #tpu.memory_space<vmem>>, vector<2x16xf32>,
    %79 = vector.extract_strided_slice %76 {offsets = [0, 16], sizes = [2, 16], strides = [1, 1]} : vector<2x32xf32> to vector<2x16xf32>
    %c12 = arith.constant 12 : index
    %c16_21 = arith.constant 16 : index
    %80 = vector.load %arg8[%c12, %c16_21] : memref<16x32xf32, #tpu.memory_space<vmem>>, vector<2x16xf32>
    tpu.vector_store %arg8[%c12, %c16_21], %79 {strides = array<i32>} : memref<16x32xf32, #tpu.memory_space<vmem>>, vector<2x16xf32>,
    %81 = vector.extract_strided_slice %8 {offsets = [4, 0], sizes = [2, 128], strides = [1, 1]} : vector<16x128xf32> to vector<2x128xf32>
    %82 = vector.extract_strided_slice %12 {offsets = [10, 0], sizes = [2, 128], strides = [1, 1]} : vector<16x128xf32> to vector<2x128xf32>
    %83 = arith.addf %81, %82 : vector<2x128xf32>
    %cst_22 = arith.constant dense<0.000000e+00> : vector<2x128xf32>
    %84 = tpu.matmul %75, %4, %cst_22 {dimension_numbers = #tpu.dot_dimension_numbers<[1], [0], [0], [1], [0, 0, 1, 1], [], []>} : vector<2x32xf32>, vector<32x128xf32>, vector<2x128xf32> -> vector<2x128xf32>
    %85 = arith.addf %84, %83 : vector<2x128xf32>
    %86 = vector.extract_strided_slice %85 {offsets = [0, 0], sizes = [2, 96], strides = [1, 1]} : vector<2x128xf32> to vector<2x96xf32>
    %87 = arith.negf %86 : vector<2x96xf32>
    %88 = math.exp %87 : vector<2x96xf32>
    %cst_23 = arith.constant 1.000000e+00 : f32
    %89 = vector.broadcast %cst_23 : f32 to vector<2x96xf32>
    %90 = arith.addf %89, %88 : vector<2x96xf32>
    %91 = arith.divf %89, %90 : vector<2x96xf32>
    %92 = vector.extract_strided_slice %85 {offsets = [0, 96], sizes = [2, 32], strides = [1, 1]} : vector<2x128xf32> to vector<2x32xf32>
    %93 = math.tanh %92 : vector<2x32xf32>
    %94 = vector.extract_strided_slice %91 {offsets = [0, 0], sizes = [2, 32], strides = [1, 1]} : vector<2x96xf32> to vector<2x32xf32>
    %95 = vector.extract_strided_slice %91 {offsets = [0, 32], sizes = [2, 32], strides = [1, 1]} : vector<2x96xf32> to vector<2x32xf32>
    %96 = vector.extract_strided_slice %91 {offsets = [0, 64], sizes = [2, 32], strides = [1, 1]} : vector<2x96xf32> to vector<2x32xf32>
    %97 = vector.extract_strided_slice %1 {offsets = [4, 0], sizes = [2, 32], strides = [1, 1]} : vector<16x48xf32> to vector<2x32xf32>
    %98 = arith.mulf %95, %70 : vector<2x32xf32>
    %99 = arith.mulf %94, %93 : vector<2x32xf32>
    %100 = arith.addf %98, %99 : vector<2x32xf32>
    %101 = arith.subf %100, %70 : vector<2x32xf32>
    %102 = arith.mulf %97, %101 : vector<2x32xf32>
    %103 = arith.addf %70, %102 : vector<2x32xf32>
    %104 = math.tanh %103 : vector<2x32xf32>
    %105 = arith.mulf %96, %104 : vector<2x32xf32>
    %106 = arith.subf %105, %75 : vector<2x32xf32>
    %107 = arith.mulf %97, %106 : vector<2x32xf32>
    %108 = arith.addf %75, %107 : vector<2x32xf32>
    %109 = arith.mulf %97, %105 : vector<2x32xf32>
    %110 = vector.extract_strided_slice %109 {offsets = [0, 0], sizes = [2, 16], strides = [1, 1]} : vector<2x32xf32> to vector<2x16xf32>
    %c4 = arith.constant 4 : index
    %c0_24 = arith.constant 0 : index
    %111 = vector.load %arg8[%c4, %c0_24] : memref<16x32xf32, #tpu.memory_space<vmem>>, vector<2x16xf32>
    tpu.vector_store %arg8[%c4, %c0_24], %110 {strides = array<i32>} : memref<16x32xf32, #tpu.memory_space<vmem>>, vector<2x16xf32>,
    %112 = vector.extract_strided_slice %109 {offsets = [0, 16], sizes = [2, 16], strides = [1, 1]} : vector<2x32xf32> to vector<2x16xf32>
    %c10 = arith.constant 10 : index
    %c16_25 = arith.constant 16 : index
    %113 = vector.load %arg8[%c10, %c16_25] : memref<16x32xf32, #tpu.memory_space<vmem>>, vector<2x16xf32>
    tpu.vector_store %arg8[%c10, %c16_25], %112 {strides = array<i32>} : memref<16x32xf32, #tpu.memory_space<vmem>>, vector<2x16xf32>,
    %114 = vector.extract_strided_slice %8 {offsets = [6, 0], sizes = [2, 128], strides = [1, 1]} : vector<16x128xf32> to vector<2x128xf32>
    %115 = vector.extract_strided_slice %12 {offsets = [8, 0], sizes = [2, 128], strides = [1, 1]} : vector<16x128xf32> to vector<2x128xf32>
    %116 = arith.addf %114, %115 : vector<2x128xf32>
    %cst_26 = arith.constant dense<0.000000e+00> : vector<2x128xf32>
    %117 = tpu.matmul %108, %4, %cst_26 {dimension_numbers = #tpu.dot_dimension_numbers<[1], [0], [0], [1], [0, 0, 1, 1], [], []>} : vector<2x32xf32>, vector<32x128xf32>, vector<2x128xf32> -> vector<2x128xf32>
    %118 = arith.addf %117, %116 : vector<2x128xf32>
    %119 = vector.extract_strided_slice %118 {offsets = [0, 0], sizes = [2, 96], strides = [1, 1]} : vector<2x128xf32> to vector<2x96xf32>
    %120 = arith.negf %119 : vector<2x96xf32>
    %121 = math.exp %120 : vector<2x96xf32>
    %cst_27 = arith.constant 1.000000e+00 : f32
    %122 = vector.broadcast %cst_27 : f32 to vector<2x96xf32>
    %123 = arith.addf %122, %121 : vector<2x96xf32>
    %124 = arith.divf %122, %123 : vector<2x96xf32>
    %125 = vector.extract_strided_slice %118 {offsets = [0, 96], sizes = [2, 32], strides = [1, 1]} : vector<2x128xf32> to vector<2x32xf32>
    %126 = math.tanh %125 : vector<2x32xf32>
    %127 = vector.extract_strided_slice %124 {offsets = [0, 0], sizes = [2, 32], strides = [1, 1]} : vector<2x96xf32> to vector<2x32xf32>
    %128 = vector.extract_strided_slice %124 {offsets = [0, 32], sizes = [2, 32], strides = [1, 1]} : vector<2x96xf32> to vector<2x32xf32>
    %129 = vector.extract_strided_slice %124 {offsets = [0, 64], sizes = [2, 32], strides = [1, 1]} : vector<2x96xf32> to vector<2x32xf32>
    %130 = vector.extract_strided_slice %1 {offsets = [6, 0], sizes = [2, 32], strides = [1, 1]} : vector<16x48xf32> to vector<2x32xf32>
    %131 = arith.mulf %128, %103 : vector<2x32xf32>
    %132 = arith.mulf %127, %126 : vector<2x32xf32>
    %133 = arith.addf %131, %132 : vector<2x32xf32>
    %134 = arith.subf %133, %103 : vector<2x32xf32>
    %135 = arith.mulf %130, %134 : vector<2x32xf32>
    %136 = arith.addf %103, %135 : vector<2x32xf32>
    %137 = math.tanh %136 : vector<2x32xf32>
    %138 = arith.mulf %129, %137 : vector<2x32xf32>
    %139 = arith.subf %138, %108 : vector<2x32xf32>
    %140 = arith.mulf %130, %139 : vector<2x32xf32>
    %141 = arith.addf %108, %140 : vector<2x32xf32>
    %142 = arith.mulf %130, %138 : vector<2x32xf32>
    %143 = vector.extract_strided_slice %142 {offsets = [0, 0], sizes = [2, 16], strides = [1, 1]} : vector<2x32xf32> to vector<2x16xf32>
    %c6 = arith.constant 6 : index
    %c0_28 = arith.constant 0 : index
    %144 = vector.load %arg8[%c6, %c0_28] : memref<16x32xf32, #tpu.memory_space<vmem>>, vector<2x16xf32>
    tpu.vector_store %arg8[%c6, %c0_28], %143 {strides = array<i32>} : memref<16x32xf32, #tpu.memory_space<vmem>>, vector<2x16xf32>,
    %145 = vector.extract_strided_slice %142 {offsets = [0, 16], sizes = [2, 16], strides = [1, 1]} : vector<2x32xf32> to vector<2x16xf32>
    %c8 = arith.constant 8 : index
    %c16_29 = arith.constant 16 : index
    %146 = vector.load %arg8[%c8, %c16_29] : memref<16x32xf32, #tpu.memory_space<vmem>>, vector<2x16xf32>
    tpu.vector_store %arg8[%c8, %c16_29], %145 {strides = array<i32>} : memref<16x32xf32, #tpu.memory_space<vmem>>, vector<2x16xf32>,
    %147 = vector.extract_strided_slice %8 {offsets = [8, 0], sizes = [2, 128], strides = [1, 1]} : vector<16x128xf32> to vector<2x128xf32>
    %148 = vector.extract_strided_slice %12 {offsets = [6, 0], sizes = [2, 128], strides = [1, 1]} : vector<16x128xf32> to vector<2x128xf32>
    %149 = arith.addf %147, %148 : vector<2x128xf32>
    %cst_30 = arith.constant dense<0.000000e+00> : vector<2x128xf32>
    %150 = tpu.matmul %141, %4, %cst_30 {dimension_numbers = #tpu.dot_dimension_numbers<[1], [0], [0], [1], [0, 0, 1, 1], [], []>} : vector<2x32xf32>, vector<32x128xf32>, vector<2x128xf32> -> vector<2x128xf32>
    %151 = arith.addf %150, %149 : vector<2x128xf32>
    %152 = vector.extract_strided_slice %151 {offsets = [0, 0], sizes = [2, 96], strides = [1, 1]} : vector<2x128xf32> to vector<2x96xf32>
    %153 = arith.negf %152 : vector<2x96xf32>
    %154 = math.exp %153 : vector<2x96xf32>
    %cst_31 = arith.constant 1.000000e+00 : f32
    %155 = vector.broadcast %cst_31 : f32 to vector<2x96xf32>
    %156 = arith.addf %155, %154 : vector<2x96xf32>
    %157 = arith.divf %155, %156 : vector<2x96xf32>
    %158 = vector.extract_strided_slice %151 {offsets = [0, 96], sizes = [2, 32], strides = [1, 1]} : vector<2x128xf32> to vector<2x32xf32>
    %159 = math.tanh %158 : vector<2x32xf32>
    %160 = vector.extract_strided_slice %157 {offsets = [0, 0], sizes = [2, 32], strides = [1, 1]} : vector<2x96xf32> to vector<2x32xf32>
    %161 = vector.extract_strided_slice %157 {offsets = [0, 32], sizes = [2, 32], strides = [1, 1]} : vector<2x96xf32> to vector<2x32xf32>
    %162 = vector.extract_strided_slice %157 {offsets = [0, 64], sizes = [2, 32], strides = [1, 1]} : vector<2x96xf32> to vector<2x32xf32>
    %163 = vector.extract_strided_slice %1 {offsets = [8, 0], sizes = [2, 32], strides = [1, 1]} : vector<16x48xf32> to vector<2x32xf32>
    %164 = arith.mulf %161, %136 : vector<2x32xf32>
    %165 = arith.mulf %160, %159 : vector<2x32xf32>
    %166 = arith.addf %164, %165 : vector<2x32xf32>
    %167 = arith.subf %166, %136 : vector<2x32xf32>
    %168 = arith.mulf %163, %167 : vector<2x32xf32>
    %169 = arith.addf %136, %168 : vector<2x32xf32>
    %170 = math.tanh %169 : vector<2x32xf32>
    %171 = arith.mulf %162, %170 : vector<2x32xf32>
    %172 = arith.subf %171, %141 : vector<2x32xf32>
    %173 = arith.mulf %163, %172 : vector<2x32xf32>
    %174 = arith.addf %141, %173 : vector<2x32xf32>
    %175 = arith.mulf %163, %171 : vector<2x32xf32>
    %176 = vector.extract_strided_slice %175 {offsets = [0, 0], sizes = [2, 16], strides = [1, 1]} : vector<2x32xf32> to vector<2x16xf32>
    %c8_32 = arith.constant 8 : index
    %c0_33 = arith.constant 0 : index
    %177 = vector.load %arg8[%c8_32, %c0_33] : memref<16x32xf32, #tpu.memory_space<vmem>>, vector<2x16xf32>
    tpu.vector_store %arg8[%c8_32, %c0_33], %176 {strides = array<i32>} : memref<16x32xf32, #tpu.memory_space<vmem>>, vector<2x16xf32>,
    %178 = vector.extract_strided_slice %175 {offsets = [0, 16], sizes = [2, 16], strides = [1, 1]} : vector<2x32xf32> to vector<2x16xf32>
    %c6_34 = arith.constant 6 : index
    %c16_35 = arith.constant 16 : index
    %179 = vector.load %arg8[%c6_34, %c16_35] : memref<16x32xf32, #tpu.memory_space<vmem>>, vector<2x16xf32>
    tpu.vector_store %arg8[%c6_34, %c16_35], %178 {strides = array<i32>} : memref<16x32xf32, #tpu.memory_space<vmem>>, vector<2x16xf32>,
    %180 = vector.extract_strided_slice %8 {offsets = [10, 0], sizes = [2, 128], strides = [1, 1]} : vector<16x128xf32> to vector<2x128xf32>
    %181 = vector.extract_strided_slice %12 {offsets = [4, 0], sizes = [2, 128], strides = [1, 1]} : vector<16x128xf32> to vector<2x128xf32>
    %182 = arith.addf %180, %181 : vector<2x128xf32>
    %cst_36 = arith.constant dense<0.000000e+00> : vector<2x128xf32>
    %183 = tpu.matmul %174, %4, %cst_36 {dimension_numbers = #tpu.dot_dimension_numbers<[1], [0], [0], [1], [0, 0, 1, 1], [], []>} : vector<2x32xf32>, vector<32x128xf32>, vector<2x128xf32> -> vector<2x128xf32>
    %184 = arith.addf %183, %182 : vector<2x128xf32>
    %185 = vector.extract_strided_slice %184 {offsets = [0, 0], sizes = [2, 96], strides = [1, 1]} : vector<2x128xf32> to vector<2x96xf32>
    %186 = arith.negf %185 : vector<2x96xf32>
    %187 = math.exp %186 : vector<2x96xf32>
    %cst_37 = arith.constant 1.000000e+00 : f32
    %188 = vector.broadcast %cst_37 : f32 to vector<2x96xf32>
    %189 = arith.addf %188, %187 : vector<2x96xf32>
    %190 = arith.divf %188, %189 : vector<2x96xf32>
    %191 = vector.extract_strided_slice %184 {offsets = [0, 96], sizes = [2, 32], strides = [1, 1]} : vector<2x128xf32> to vector<2x32xf32>
    %192 = math.tanh %191 : vector<2x32xf32>
    %193 = vector.extract_strided_slice %190 {offsets = [0, 0], sizes = [2, 32], strides = [1, 1]} : vector<2x96xf32> to vector<2x32xf32>
    %194 = vector.extract_strided_slice %190 {offsets = [0, 32], sizes = [2, 32], strides = [1, 1]} : vector<2x96xf32> to vector<2x32xf32>
    %195 = vector.extract_strided_slice %190 {offsets = [0, 64], sizes = [2, 32], strides = [1, 1]} : vector<2x96xf32> to vector<2x32xf32>
    %196 = vector.extract_strided_slice %1 {offsets = [10, 0], sizes = [2, 32], strides = [1, 1]} : vector<16x48xf32> to vector<2x32xf32>
    %197 = arith.mulf %194, %169 : vector<2x32xf32>
    %198 = arith.mulf %193, %192 : vector<2x32xf32>
    %199 = arith.addf %197, %198 : vector<2x32xf32>
    %200 = arith.subf %199, %169 : vector<2x32xf32>
    %201 = arith.mulf %196, %200 : vector<2x32xf32>
    %202 = arith.addf %169, %201 : vector<2x32xf32>
    %203 = math.tanh %202 : vector<2x32xf32>
    %204 = arith.mulf %195, %203 : vector<2x32xf32>
    %205 = arith.subf %204, %174 : vector<2x32xf32>
    %206 = arith.mulf %196, %205 : vector<2x32xf32>
    %207 = arith.addf %174, %206 : vector<2x32xf32>
    %208 = arith.mulf %196, %204 : vector<2x32xf32>
    %209 = vector.extract_strided_slice %208 {offsets = [0, 0], sizes = [2, 16], strides = [1, 1]} : vector<2x32xf32> to vector<2x16xf32>
    %c10_38 = arith.constant 10 : index
    %c0_39 = arith.constant 0 : index
    %210 = vector.load %arg8[%c10_38, %c0_39] : memref<16x32xf32, #tpu.memory_space<vmem>>, vector<2x16xf32>
    tpu.vector_store %arg8[%c10_38, %c0_39], %209 {strides = array<i32>} : memref<16x32xf32, #tpu.memory_space<vmem>>, vector<2x16xf32>,
    %211 = vector.extract_strided_slice %208 {offsets = [0, 16], sizes = [2, 16], strides = [1, 1]} : vector<2x32xf32> to vector<2x16xf32>
    %c4_40 = arith.constant 4 : index
    %c16_41 = arith.constant 16 : index
    %212 = vector.load %arg8[%c4_40, %c16_41] : memref<16x32xf32, #tpu.memory_space<vmem>>, vector<2x16xf32>
    tpu.vector_store %arg8[%c4_40, %c16_41], %211 {strides = array<i32>} : memref<16x32xf32, #tpu.memory_space<vmem>>, vector<2x16xf32>,
    %213 = vector.extract_strided_slice %8 {offsets = [12, 0], sizes = [2, 128], strides = [1, 1]} : vector<16x128xf32> to vector<2x128xf32>
    %214 = vector.extract_strided_slice %12 {offsets = [2, 0], sizes = [2, 128], strides = [1, 1]} : vector<16x128xf32> to vector<2x128xf32>
    %215 = arith.addf %213, %214 : vector<2x128xf32>
    %cst_42 = arith.constant dense<0.000000e+00> : vector<2x128xf32>
    %216 = tpu.matmul %207, %4, %cst_42 {dimension_numbers = #tpu.dot_dimension_numbers<[1], [0], [0], [1], [0, 0, 1, 1], [], []>} : vector<2x32xf32>, vector<32x128xf32>, vector<2x128xf32> -> vector<2x128xf32>
    %217 = arith.addf %216, %215 : vector<2x128xf32>
    %218 = vector.extract_strided_slice %217 {offsets = [0, 0], sizes = [2, 96], strides = [1, 1]} : vector<2x128xf32> to vector<2x96xf32>
    %219 = arith.negf %218 : vector<2x96xf32>
    %220 = math.exp %219 : vector<2x96xf32>
    %cst_43 = arith.constant 1.000000e+00 : f32
    %221 = vector.broadcast %cst_43 : f32 to vector<2x96xf32>
    %222 = arith.addf %221, %220 : vector<2x96xf32>
    %223 = arith.divf %221, %222 : vector<2x96xf32>
    %224 = vector.extract_strided_slice %217 {offsets = [0, 96], sizes = [2, 32], strides = [1, 1]} : vector<2x128xf32> to vector<2x32xf32>
    %225 = math.tanh %224 : vector<2x32xf32>
    %226 = vector.extract_strided_slice %223 {offsets = [0, 0], sizes = [2, 32], strides = [1, 1]} : vector<2x96xf32> to vector<2x32xf32>
    %227 = vector.extract_strided_slice %223 {offsets = [0, 32], sizes = [2, 32], strides = [1, 1]} : vector<2x96xf32> to vector<2x32xf32>
    %228 = vector.extract_strided_slice %223 {offsets = [0, 64], sizes = [2, 32], strides = [1, 1]} : vector<2x96xf32> to vector<2x32xf32>
    %229 = vector.extract_strided_slice %1 {offsets = [12, 0], sizes = [2, 32], strides = [1, 1]} : vector<16x48xf32> to vector<2x32xf32>
    %230 = arith.mulf %227, %202 : vector<2x32xf32>
    %231 = arith.mulf %226, %225 : vector<2x32xf32>
    %232 = arith.addf %230, %231 : vector<2x32xf32>
    %233 = arith.subf %232, %202 : vector<2x32xf32>
    %234 = arith.mulf %229, %233 : vector<2x32xf32>
    %235 = arith.addf %202, %234 : vector<2x32xf32>
    %236 = math.tanh %235 : vector<2x32xf32>
    %237 = arith.mulf %228, %236 : vector<2x32xf32>
    %238 = arith.subf %237, %207 : vector<2x32xf32>
    %239 = arith.mulf %229, %238 : vector<2x32xf32>
    %240 = arith.addf %207, %239 : vector<2x32xf32>
    %241 = arith.mulf %229, %237 : vector<2x32xf32>
    %242 = vector.extract_strided_slice %241 {offsets = [0, 0], sizes = [2, 16], strides = [1, 1]} : vector<2x32xf32> to vector<2x16xf32>
    %c12_44 = arith.constant 12 : index
    %c0_45 = arith.constant 0 : index
    %243 = vector.load %arg8[%c12_44, %c0_45] : memref<16x32xf32, #tpu.memory_space<vmem>>, vector<2x16xf32>
    tpu.vector_store %arg8[%c12_44, %c0_45], %242 {strides = array<i32>} : memref<16x32xf32, #tpu.memory_space<vmem>>, vector<2x16xf32>,
    %244 = vector.extract_strided_slice %241 {offsets = [0, 16], sizes = [2, 16], strides = [1, 1]} : vector<2x32xf32> to vector<2x16xf32>
    %c2_46 = arith.constant 2 : index
    %c16_47 = arith.constant 16 : index
    %245 = vector.load %arg8[%c2_46, %c16_47] : memref<16x32xf32, #tpu.memory_space<vmem>>, vector<2x16xf32>
    tpu.vector_store %arg8[%c2_46, %c16_47], %244 {strides = array<i32>} : memref<16x32xf32, #tpu.memory_space<vmem>>, vector<2x16xf32>,
    %246 = vector.extract_strided_slice %8 {offsets = [14, 0], sizes = [2, 128], strides = [1, 1]} : vector<16x128xf32> to vector<2x128xf32>
    %247 = vector.extract_strided_slice %12 {offsets = [0, 0], sizes = [2, 128], strides = [1, 1]} : vector<16x128xf32> to vector<2x128xf32>
    %248 = arith.addf %246, %247 : vector<2x128xf32>
    %cst_48 = arith.constant dense<0.000000e+00> : vector<2x128xf32>
    %249 = tpu.matmul %240, %4, %cst_48 {dimension_numbers = #tpu.dot_dimension_numbers<[1], [0], [0], [1], [0, 0, 1, 1], [], []>} : vector<2x32xf32>, vector<32x128xf32>, vector<2x128xf32> -> vector<2x128xf32>
    %250 = arith.addf %249, %248 : vector<2x128xf32>
    %251 = vector.extract_strided_slice %250 {offsets = [0, 0], sizes = [2, 96], strides = [1, 1]} : vector<2x128xf32> to vector<2x96xf32>
    %252 = arith.negf %251 : vector<2x96xf32>
    %253 = math.exp %252 : vector<2x96xf32>
    %cst_49 = arith.constant 1.000000e+00 : f32
    %254 = vector.broadcast %cst_49 : f32 to vector<2x96xf32>
    %255 = arith.addf %254, %253 : vector<2x96xf32>
    %256 = arith.divf %254, %255 : vector<2x96xf32>
    %257 = vector.extract_strided_slice %250 {offsets = [0, 96], sizes = [2, 32], strides = [1, 1]} : vector<2x128xf32> to vector<2x32xf32>
    %258 = math.tanh %257 : vector<2x32xf32>
    %259 = vector.extract_strided_slice %256 {offsets = [0, 0], sizes = [2, 32], strides = [1, 1]} : vector<2x96xf32> to vector<2x32xf32>
    %260 = vector.extract_strided_slice %256 {offsets = [0, 32], sizes = [2, 32], strides = [1, 1]} : vector<2x96xf32> to vector<2x32xf32>
    %261 = vector.extract_strided_slice %256 {offsets = [0, 64], sizes = [2, 32], strides = [1, 1]} : vector<2x96xf32> to vector<2x32xf32>
    %262 = vector.extract_strided_slice %1 {offsets = [14, 0], sizes = [2, 32], strides = [1, 1]} : vector<16x48xf32> to vector<2x32xf32>
    %263 = arith.mulf %260, %235 : vector<2x32xf32>
    %264 = arith.mulf %259, %258 : vector<2x32xf32>
    %265 = arith.addf %263, %264 : vector<2x32xf32>
    %266 = arith.subf %265, %235 : vector<2x32xf32>
    %267 = arith.mulf %262, %266 : vector<2x32xf32>
    %268 = arith.addf %235, %267 : vector<2x32xf32>
    %269 = math.tanh %268 : vector<2x32xf32>
    %270 = arith.mulf %261, %269 : vector<2x32xf32>
    %271 = arith.mulf %262, %270 : vector<2x32xf32>
    %272 = vector.extract_strided_slice %271 {offsets = [0, 0], sizes = [2, 16], strides = [1, 1]} : vector<2x32xf32> to vector<2x16xf32>
    %c14_50 = arith.constant 14 : index
    %c0_51 = arith.constant 0 : index
    %273 = vector.load %arg8[%c14_50, %c0_51] : memref<16x32xf32, #tpu.memory_space<vmem>>, vector<2x16xf32>
    tpu.vector_store %arg8[%c14_50, %c0_51], %272 {strides = array<i32>} : memref<16x32xf32, #tpu.memory_space<vmem>>, vector<2x16xf32>,
    %274 = vector.extract_strided_slice %271 {offsets = [0, 16], sizes = [2, 16], strides = [1, 1]} : vector<2x32xf32> to vector<2x16xf32>
    %c0_52 = arith.constant 0 : index
    %c16_53 = arith.constant 16 : index
    %275 = vector.load %arg8[%c0_52, %c16_53] : memref<16x32xf32, #tpu.memory_space<vmem>>, vector<2x16xf32>
    tpu.vector_store %arg8[%c0_52, %c16_53], %274 {strides = array<i32>} : memref<16x32xf32, #tpu.memory_space<vmem>>, vector<2x16xf32>,
    %c0_54 = arith.constant 0 : index
    %c0_55 = arith.constant 0 : index
    %276 = vector.load %arg8[%c0_54, %c0_55] : memref<16x32xf32, #tpu.memory_space<vmem>>, vector<16x32xf32>
    %277 = vector.extract_strided_slice %1 {offsets = [0, 0], sizes = [16, 1], strides = [1, 1]} : vector<16x48xf32> to vector<16x1xf32>
    %278 = vector.extract_strided_slice %1 {offsets = [0, 32], sizes = [16, 16], strides = [1, 1]} : vector<16x48xf32> to vector<16x16xf32>
    %c0_56 = arith.constant 0 : index
    %c0_57 = arith.constant 0 : index
    %279 = vector.load %arg2[%c0_56, %c0_57] : memref<16x24xf32, #tpu.memory_space<vmem>>, vector<16x24xf32>
    %c0_58 = arith.constant 0 : index
    %c0_59 = arith.constant 0 : index
    %280 = vector.load %arg4[%c0_58, %c0_59] : memref<24x32xf32, #tpu.memory_space<vmem>>, vector<24x32xf32>
    %cst_60 = arith.constant dense<0.000000e+00> : vector<16x32xf32>
    %281 = tpu.matmul %279, %280, %cst_60 {dimension_numbers = #tpu.dot_dimension_numbers<[1], [0], [0], [1], [0, 0, 1, 1], [], []>} : vector<16x24xf32>, vector<24x32xf32>, vector<16x32xf32> -> vector<16x32xf32>
    %c2_61 = arith.constant 2 : index
    %c0_62 = arith.constant 0 : index
    %282 = vector.load %arg6[%c2_61, %c0_62] : memref<5x128xf32, #tpu.memory_space<vmem>>, vector<1x32xf32>
    %283 = vector.broadcast %282 : vector<1x32xf32> to vector<16x32xf32>
    %284 = arith.addf %281, %283 : vector<16x32xf32>
    %285 = arith.mulf %284, %284 : vector<16x32xf32>
    %cst_63 = arith.constant dense<0.000000e+00> : vector<16xf32>
    %286 = vector.multi_reduction <add>, %285, %cst_63 [1] : vector<16x32xf32> to vector<16xf32>
    %287 = vector.shape_cast %286 : vector<16xf32> to vector<16x1xf32>
    %cst_64 = arith.constant 1.000000e-24 : f32
    %288 = vector.broadcast %cst_64 : f32 to vector<16x1xf32>
    %289 = arith.maximumf %287, %288 : vector<16x1xf32>
    %290 = math.rsqrt %289 : vector<16x1xf32>
    %291 = vector.broadcast %290 : vector<16x1xf32> to vector<16x32xf32>
    %292 = arith.mulf %284, %291 : vector<16x32xf32>
    %293 = arith.mulf %276, %276 : vector<16x32xf32>
    %cst_65 = arith.constant dense<0.000000e+00> : vector<16xf32>
    %294 = vector.multi_reduction <add>, %293, %cst_65 [1] : vector<16x32xf32> to vector<16xf32>
    %295 = vector.shape_cast %294 : vector<16xf32> to vector<16x1xf32>
    %cst_66 = arith.constant 1.000000e-24 : f32
    %296 = vector.broadcast %cst_66 : f32 to vector<16x1xf32>
    %297 = arith.maximumf %295, %296 : vector<16x1xf32>
    %298 = math.rsqrt %297 : vector<16x1xf32>
    %299 = vector.broadcast %298 : vector<16x1xf32> to vector<16x32xf32>
    %300 = arith.mulf %276, %299 : vector<16x32xf32>
    %cst_67 = arith.constant dense<0.000000e+00> : vector<16x16xf32>
    %301 = tpu.matmul %300, %292, %cst_67 {dimension_numbers = #tpu.dot_dimension_numbers<[1], [1], [0], [0], [0, 0, 1, 0], [], []>} : vector<16x32xf32>, vector<16x32xf32>, vector<16x16xf32> -> vector<16x16xf32>
    %cst_68 = arith.constant 0.000000e+00 : f32
    %302 = vector.broadcast %cst_68 : f32 to vector<16x16xf32>
    %303 = arith.maximumf %301, %302 : vector<16x16xf32>
    %304 = arith.mulf %303, %278 : vector<16x16xf32>
    %305 = arith.mulf %304, %304 : vector<16x16xf32>
    %cst_69 = arith.constant dense<0.000000e+00> : vector<16xf32>
    %306 = vector.multi_reduction <add>, %305, %cst_69 [0] : vector<16x16xf32> to vector<16xf32>
    %307 = vector.shape_cast %306 : vector<16xf32> to vector<1x16xf32>
    %cst_70 = arith.constant 1.000000e-24 : f32
    %308 = vector.broadcast %cst_70 : f32 to vector<1x16xf32>
    %309 = arith.maximumf %307, %308 : vector<1x16xf32>
    %310 = math.rsqrt %309 : vector<1x16xf32>
    %311 = vector.broadcast %310 : vector<1x16xf32> to vector<16x16xf32>
    %312 = arith.mulf %304, %311 : vector<16x16xf32>
    %cst_71 = arith.constant 1.000000e+00 : f32
    %313 = vector.broadcast %cst_71 : f32 to vector<16x16xf32>
    %314 = arith.mulf %313, %312 : vector<16x16xf32>
    %cst_72 = arith.constant dense<0xFF800000> : vector<16xf32>
    %315 = vector.multi_reduction <maximumf>, %314, %cst_72 [1] : vector<16x16xf32> to vector<16xf32>
    %316 = vector.shape_cast %315 : vector<16xf32> to vector<16x1xf32>
    %317 = vector.broadcast %316 : vector<16x1xf32> to vector<16x16xf32>
    %318 = arith.subf %314, %317 : vector<16x16xf32>
    %319 = math.exp %318 : vector<16x16xf32>
    %320 = arith.mulf %319, %278 : vector<16x16xf32>
    %cst_73 = arith.constant dense<0.000000e+00> : vector<16xf32>
    %321 = vector.multi_reduction <add>, %320, %cst_73 [1] : vector<16x16xf32> to vector<16xf32>
    %322 = vector.shape_cast %321 : vector<16xf32> to vector<16x1xf32>
    %323 = tpu.reciprocal %322 {approx = true} : vector<16x1xf32> -> vector<16x1xf32>
    %324 = vector.broadcast %323 : vector<16x1xf32> to vector<16x16xf32>
    %325 = arith.mulf %320, %324 : vector<16x16xf32>
    %326 = vector.broadcast %277 : vector<16x1xf32> to vector<16x16xf32>
    %327 = arith.mulf %325, %326 : vector<16x16xf32>
    %cst_74 = arith.constant dense<0.000000e+00> : vector<16x32xf32>
    %328 = tpu.matmul %327, %284, %cst_74 {dimension_numbers = #tpu.dot_dimension_numbers<[1], [0], [0], [1], [0, 0, 1, 1], [], []>} : vector<16x16xf32>, vector<16x32xf32>, vector<16x32xf32> -> vector<16x32xf32>
    %c0_75 = arith.constant 0 : index
    %c0_76 = arith.constant 0 : index
    %329 = vector.load %arg5[%c0_75, %c0_76] : memref<32x384xf32, #tpu.memory_space<vmem>>, vector<32x26xf32>
    %c0_77 = arith.constant 0 : index
    %c128 = arith.constant 128 : index
    %330 = vector.load %arg5[%c0_77, %c128] : memref<32x384xf32, #tpu.memory_space<vmem>>, vector<32x48xf32>
    %c0_78 = arith.constant 0 : index
    %c256 = arith.constant 256 : index
    %331 = vector.load %arg5[%c0_78, %c256] : memref<32x384xf32, #tpu.memory_space<vmem>>, vector<32x10xf32>
    %cst_79 = arith.constant dense<0.000000e+00> : vector<16x26xf32>
    %332 = tpu.matmul %276, %329, %cst_79 {dimension_numbers = #tpu.dot_dimension_numbers<[1], [0], [0], [1], [0, 0, 1, 1], [], []>} : vector<16x32xf32>, vector<32x26xf32>, vector<16x26xf32> -> vector<16x26xf32>
    %cst_80 = arith.constant dense<0.000000e+00> : vector<16x48xf32>
    %333 = tpu.matmul %328, %330, %cst_80 {dimension_numbers = #tpu.dot_dimension_numbers<[1], [0], [0], [1], [0, 0, 1, 1], [], []>} : vector<16x32xf32>, vector<32x48xf32>, vector<16x48xf32> -> vector<16x48xf32>
    %c3 = arith.constant 3 : index
    %c0_81 = arith.constant 0 : index
    %334 = vector.load %arg6[%c3, %c0_81] : memref<5x128xf32, #tpu.memory_space<vmem>>, vector<1x48xf32>
    %335 = vector.broadcast %334 : vector<1x48xf32> to vector<16x48xf32>
    %336 = arith.addf %333, %335 : vector<16x48xf32>
    %337 = vector.extract_strided_slice %332 {offsets = [0, 0], sizes = [16, 16], strides = [1, 1]} : vector<16x26xf32> to vector<16x16xf32>
    %338 = vector.extract_strided_slice %336 {offsets = [0, 0], sizes = [16, 16], strides = [1, 1]} : vector<16x48xf32> to vector<16x16xf32>
    %339 = tpu.concatenate %337, %338 in 1 : vector<16x16xf32>, vector<16x16xf32> -> vector<16x32xf32>
    %340 = arith.negf %339 : vector<16x32xf32>
    %341 = math.exp %340 : vector<16x32xf32>
    %cst_82 = arith.constant 1.000000e+00 : f32
    %342 = vector.broadcast %cst_82 : f32 to vector<16x32xf32>
    %343 = arith.addf %342, %341 : vector<16x32xf32>
    %344 = arith.divf %342, %343 : vector<16x32xf32>
    %345 = vector.extract_strided_slice %336 {offsets = [0, 16], sizes = [16, 32], strides = [1, 1]} : vector<16x48xf32> to vector<16x32xf32>
    %346 = math.tanh %345 : vector<16x32xf32>
    %347 = arith.mulf %344, %346 : vector<16x32xf32>
    %348 = vector.extract_strided_slice %332 {offsets = [0, 16], sizes = [16, 10], strides = [1, 1]} : vector<16x26xf32> to vector<16x10xf32>
    %cst_83 = arith.constant dense<0.000000e+00> : vector<16x10xf32>
    %349 = tpu.matmul %347, %331, %cst_83 {dimension_numbers = #tpu.dot_dimension_numbers<[1], [0], [0], [1], [0, 0, 1, 1], [], []>} : vector<16x32xf32>, vector<32x10xf32>, vector<16x10xf32> -> vector<16x10xf32>
    %350 = arith.addf %348, %349 : vector<16x10xf32>
    %c4_84 = arith.constant 4 : index
    %c0_85 = arith.constant 0 : index
    %351 = vector.load %arg6[%c4_84, %c0_85] : memref<5x128xf32, #tpu.memory_space<vmem>>, vector<1x10xf32>
    %352 = vector.broadcast %351 : vector<1x10xf32> to vector<16x10xf32>
    %353 = arith.addf %350, %352 : vector<16x10xf32>
    %cst_86 = arith.constant dense<0xFF800000> : vector<16xf32>
    %354 = vector.multi_reduction <maximumf>, %353, %cst_86 [1] : vector<16x10xf32> to vector<16xf32>
    %355 = vector.shape_cast %354 : vector<16xf32> to vector<16x1xf32>
    %356 = vector.broadcast %355 : vector<16x1xf32> to vector<16x10xf32>
    %357 = arith.subf %353, %356 : vector<16x10xf32>
    %358 = math.exp %357 : vector<16x10xf32>
    %cst_87 = arith.constant dense<0.000000e+00> : vector<16xf32>
    %359 = vector.multi_reduction <add>, %358, %cst_87 [1] : vector<16x10xf32> to vector<16xf32>
    %360 = vector.shape_cast %359 : vector<16xf32> to vector<16x1xf32>
    %361 = math.log %360 : vector<16x1xf32>
    %362 = arith.addf %355, %361 : vector<16x1xf32>
    %363 = vector.broadcast %362 : vector<16x1xf32> to vector<16x10xf32>
    %364 = arith.subf %353, %363 : vector<16x10xf32>
    %c0_88 = arith.constant 0 : index
    %c0_89 = arith.constant 0 : index
    %365 = vector.load %arg7[%c0_88, %c0_89] : memref<16x10xf32, #tpu.memory_space<vmem>>, vector<16x10xf32>
    tpu.vector_store %arg7[%c0_88, %c0_89], %364 {strides = array<i32>} : memref<16x10xf32, #tpu.memory_space<vmem>>, vector<16x10xf32>,
    return
  }
}

</mosaic_0001>

<bundles_post_ra>
// kernel: _lambda_.1
= control target key start
LH: loop header
LB: loop body
LE: loop exit
PB: predicated region body
PF: predicated region fallthrough
CT: control target
= control target key end

     0   :  { %vm41_vm0 = vcmask 130048   ;;  %s1938_s0 = inlined_call_operand.vmem [shape: f32[16,16], index: 0, kind: input, shape index: {}]   ;;  %s1939_s1 = inlined_call_operand.vmem [shape: f32[16,48], index: 1, kind: input, shape index: {}]   ;;  %s1940_s2 = inlined_call_operand.vmem [shape: f32[16,24], index: 2, kind: input, shape index: {}]   ;;  %s1941_s3 = inlined_call_operand.vmem [shape: f32[64,128], index: 3, kind: input, shape index: {}]   ;;  %s1942_s4 = inlined_call_operand.vmem [shape: f32[24,32], index: 4, kind: input, shape index: {}]   ;;  %s1943_s5 = inlined_call_operand.vmem [shape: f32[32,384], index: 5, kind: input, shape index: {}]   ;;  %s1944_s6 = inlined_call_operand.vmem [shape: f32[5,128], index: 6, kind: input, shape index: {}]   ;;  %s1945_s7 = inlined_call_operand.hbm [shape: f32[16,10], index: 7, kind: output, shape index: {}]  }
   0x1   :  { %v32_v0 = vld [vmem:[%s1941_s3 + $0x8] sm:$0xff]  ;;  %v31_v1 = vld [vmem:[%s1941_s3] sm:$0xff]  ;;  %v34_v2 = vld [vmem:[%s1941_s3 + $0x18] sm:$0xff] }
   0x2   :  { %1380 = vmatpush.msra.mxu2 %v32_v0  ;;  %1382 = vmatpush.msra.mxu3 %v34_v2  ;;  %v28_v3 = vld [vmem:[%s1938_s0 + $0x8] sm:$0xff]  ;;  %v33_v4 = vld [vmem:[%s1941_s3 + $0x10] sm:$0xff]  ;;  %v1599_v5 = vld [vmem:[%s1941_s3 + $0x38] sm:$0xff] }
   0x3   :  { %87 = vmatpush.msra.mxu1 %v34_v2  ;;  %62 = vmatpush.msra.mxu0 %v32_v0  ;;  %v1604_v6 = vld [vmem:[%s1941_s3 + $0x30] sm:$0xff]  ;;  %v27_v7 = vld [vmem:[%s1938_s0] sm:$0xff] }
   0x4   :  { %1381 = vmatpush.msra.mxu2 %v31_v1  ;;  %1383 = vmatpush.msra.mxu3 %v33_v4 }
   0x5   :  { %1346 = vmatmul.msk.f32.vlgmr.msra.gmra.mxu2 %vm41_vm0, %v28_v3  ;;  %1348 = vmatmul.msk.f32.vlgmr.msra.gmra.mxu3 %vm41_vm0, %v28_v3 }
   0x6   :  { %116 = vmatpush.msrb.mxu2 %v1599_v5  ;;  %88 = vmatpush.msra.mxu1 %v33_v4 }
   0x7   :  { %12 = vsyncpa [#allocation4], 0  ;;  %1347 = vmatmul.msk.f32.vlgmr.msra.gmra.mxu1 %vm41_vm0, %v27_v7  ;;  %v1616_v8 = vld [vmem:[%s1941_s3 + $0x28] sm:$0xff]  ;;  %63 = vmatpush.msra.mxu0 %v31_v1  ;;  %v1623_v9 = vld [vmem:[%s1941_s3 + $0x20] sm:$0xff]  ;;  %v1531_v10 = vmov 0.0   ;;  %s1532_s23 = smov 32  }
   0x8   :  { %117 = vmatpush.msrb.mxu2 %v1604_v6  ;;  %1345 = vmatmul.msk.f32.vlgmr.msra.gmra.mxu0 %vm41_vm0, %v27_v7  ;;  %v1397_v11 = vld [vmem:[%s1944_s6 + $0x1] ss:$0 sm:$0xff]  ;;  %v1398_v14 = vld [vmem:[%s1944_s6] ss:$0 sm:$0xff]  ;;  %s1533_s24 = smov 96   ;;  %s1534_s27 = smov 64  }
   0x9   :  { %198 = vmatpush.msrb.mxu3 %v1599_v5  ;;  %504 = vmatpush.msrb.mxu0 %v1599_v5  ;;  %v1672_v50 = vld [vmem:[%s1939_s1] sm:$0xff]  ;;  %vm100_vm5 = vcmask 261120   ;;  %vm173_vm6 = vcmask 123904   ;;  %vm175_vm7 = vcmask 255104   ;;  %s1536_s11 = smov 16   ;;  %s1537_s12 = smov 112  }
   0xa   :  { %118 = vmatpush.msrb.mxu2 %v1616_v8  ;;  %598 = vmatpush.msrb.mxu1 %v1599_v5  ;;  %s1333_s21 = sshll.u32 %s1945_s7, 4  ;;  %s1539_s22 = smov 128   ;;  %s1334_s21 = int_to_ptr.hbm [resolvable:$true] %s1333_s21 }
   0xb   :  { %199 = vmatpush.msrb.mxu3 %v1604_v6  ;;  %505 = vmatpush.msrb.mxu0 %v1604_v6 }
   0xc   :  { %119 = vmatpush.msrb.mxu2 %v1623_v9  ;;  %599 = vmatpush.msrb.mxu1 %v1604_v6 }
   0xd   :  { %120 = vmatmul.f32.vlgmr.msrb.gmra.mxu2 %v1531_v10  ;;  %200 = vmatpush.msrb.mxu3 %v1616_v8 }
   0xe   :  { %300 = vmatpush.msra.mxu2 %v1599_v5  ;;  %506 = vmatpush.msrb.mxu0 %v1616_v8 }
   0xf   :  { %201 = vmatpush.msrb.mxu3 %v1623_v9  ;;  %600 = vmatpush.msrb.mxu1 %v1616_v8 }
  0x10   :  { %301 = vmatpush.msra.mxu2 %v1604_v6  ;;  %507 = vmatpush.msrb.mxu0 %v1623_v9 }
  0x11   :  { %401 = vmatpush.msra.mxu3 %v1599_v5  ;;  %601 = vmatpush.msrb.mxu1 %v1623_v9 }
  0x12   :  { %302 = vmatpush.msra.mxu2 %v1616_v8 }
  0x13   :  { %402 = vmatpush.msra.mxu3 %v1604_v6 }
  0x14   :  { %303 = vmatpush.msra.mxu2 %v1623_v9 }
  0x15   :  { %403 = vmatpush.msra.mxu3 %v1616_v8 }
  0x16   :  { %698 = vmatpush.msrb.mxu2 %v1599_v5 }
  0x17   :  { %404 = vmatpush.msra.mxu3 %v1623_v9 }
  0x18   :  { %699 = vmatpush.msrb.mxu2 %v1604_v6 }
  0x1a   :  { %700 = vmatpush.msrb.mxu2 %v1616_v8 }
  0x1c   :  { %701 = vmatpush.msrb.mxu2 %v1623_v9 }
  0x84   :  { %v90_v12 = vpop.f32.mrf.mxu1 }
  0x85   :  { %v91_v13 = vadd.f32 %v1397_v11, %v90_v12  ;;  %v65_v15 = vpop.f32.mrf.mxu0 }
  0x86   :  { %v66_v22 = vadd.f32 %v1398_v14, %v65_v15 }
  0x87   :  { %v486_v16 = vrot.slane %v91_v13, 6  ;;  %v577_v17 = vrot.slane %v91_v13, 2 }
  0x88   :  { %v68_v18 = vpop.f32.mrf.mxu2  ;;  %v93_v19 = vpop.f32.mrf.mxu3 }
  0x89   :  { %v69_v20 = vadd.f32 %v1398_v14, %v68_v18  ;;  %v94_v21 = vadd.f32 %v1397_v11, %v93_v19 }
  0x8b   :  { %v1657_v23 = vadd.f32 %v577_v17, %v69_v20  ;;  %v97_v24 = vrot.slane %v94_v21, 6  ;;  %v177_v25 = vrot.slane %v94_v21, 2  ;;  %v1659_v26 = vadd.f32 %v486_v16, %v69_v20 }
  0x8d   :  { %v1661_v27 = vadd.f32 %v177_v25, %v66_v22  ;;  %v1663_v28 = vadd.f32 %v97_v24, %v66_v22 }
  0x8f   :  { %v181_v58 = vrot.slane %v1661_v27, 2 }
  0x90   :  { %v121_v29 = vpop.f32.mrf.mxu2 }
  0x91   :  { %v122_v30 = vadd.f32 %v121_v29, %v1663_v28 }
  0x93   :  { %1402 = vtanh.f32 %v122_v30  ;;  %v1349_v32 = vmul.f32 -1.442695, %v122_v30 }
  0x95   :  { %1404 = vpow2.f32 %v1349_v32 }
  0x99   :  { %v1403_v31 = vpop.eup %1402 }
  0x9a   :  { %146 = vrot.lane.b32.xlu0 %v1403_v31, %s1532_s23 }
  0x9b   :  { %v1405_v33 = vpop.eup %1404 }
  0x9c   :  { %v127_v34 = vadd.f32 1.0, %v1405_v33 }
  0x9e   :  { %1406 = vrcp.f32 %v127_v34  ;;  %v139_v40 = vand.u32 2147483648, %v127_v34  ;;  %vm133_vm2 = vweird.f32 %v127_v34  ;;  %v137_v41 = vand.u32 2147483647, %v127_v34 }
  0xa0   :  { %v140_v43 = vor.u32 1.1754944e-38, %v139_v40  ;;  %vm138_vm4 = vcmp.eq.f32.partialorder %v137_v41, 8.507059e+37 }
  0xa4   :  { %v1407_v35 = vpop.eup %1406 }
  0xa5   :  { %v129_v36 = vmul.f32 %v1407_v35, %v127_v34  ;;  %vm134_vm1 = vweird.f32 %v1407_v35 }
  0xa6   :  { %vm135_vm3 = vmor %vm133_vm2, %vm134_vm1 }
  0xa7   :  { %v130_v37 = vsub.f32 1.0, %v129_v36 }
  0xa9   :  { %v131_v38 = vmul.f32 %v1407_v35, %v130_v37  ;;  %v283_v37 = vrot.slane %v1663_v28, 4 }
  0xab   :  { %v132_v39 = vadd.f32 %v1407_v35, %v131_v38 }
  0xad   :  { %v136_v42 = vsel %vm135_vm3, %v1407_v35, %v132_v39 }
  0xae   :  { %v141_v45 = vsel %vm138_vm4, %v140_v43, %v136_v42 }
  0xaf   :  { %v144_v47 = vmul.f32 0.0, %v141_v45 }
 0x10c   :  { %v147_v44 = vpop.permute.xlu0 %146 }
 0x10d   :  { %v149_v46 = vmul.f32 %v147_v44, %v141_v45 }
 0x10f   :  { %151 = vrot.lane.b32.xlu0 %v149_v46, %s1532_s23 }
 0x181   :  { %v152_v48 = vpop.permute.xlu0 %151 }
 0x182   :  { %v154_v49 = vadd.f32 %v152_v48, %v144_v47 }
 0x184   :  { %156 = vrot.lane.b32.xlu1 %v154_v49, %s1533_s24 }
 0x1f6   :  { %v157_v51 = vpop.permute.xlu1 %156 }
 0x1f7   :  { %v159_v52 = vmul.f32 %v157_v51, %v1672_v50 }
 0x1f9   :  { %1408 = vtanh.f32 %v159_v52  ;;  %227 = vrot.lane.b32.xlu0 %v159_v52, %s1532_s23 }
 0x1ff   :  { %v1409_v53 = vpop.eup %1408 }
 0x200   :  { %163 = vrot.lane.b32.xlu1 %v1409_v53, %s1534_s27 }
 0x26b   :  { %v228_v13 = vpop.permute.xlu0 %227 }
 0x272   :  { %v164_v54 = vpop.permute.xlu1 %163 }
 0x273   :  { %v166_v55 = vmul.f32 %v164_v54, %v141_v45 }
 0x275   :  { %168 = vrot.lane.b32.xlu2 %v166_v55, %s1534_s27 }
 0x2cf   :  { %v169_v56 = vpop.permute.xlu2 %168 }
 0x2d0   :  { %v171_v57 = vmul.f32 %v169_v56, %v1672_v50 }
 0x2d2   :  { %1350 = vmatmul.msk.f32.vlgmr.msrb.gmra.mxu3 %vm100_vm5, %v171_v57  ;;  %174 = vst.msk [vmem:[#allocation2] sm:$0x3] %vm173_vm6, %v171_v57 }
 0x2d3   :  { %797 = vmatpush.msrb.mxu3 %v1599_v5  ;;  %176 = vst.msk [vmem:[#allocation2 + $0xe] sm:$0x3] %vm175_vm7, %v171_v57 }
 0x2d5   :  { %798 = vmatpush.msrb.mxu3 %v1604_v6 }
 0x2d7   :  { %799 = vmatpush.msrb.mxu3 %v1616_v8 }
 0x2d9   :  { %800 = vmatpush.msrb.mxu3 %v1623_v9 }
 0x355   :  { %v203_v59 = vpop.f32.mrf.mxu3 }
 0x356   :  { %v204_v60 = vadd.f32 %v203_v59, %v181_v58 }
 0x358   :  { %1410 = vtanh.f32 %v204_v60  ;;  %v1351_v62 = vmul.f32 -1.442695, %v204_v60 }
 0x35a   :  { %1412 = vpow2.f32 %v1351_v62 }
 0x35e   :  { %v1411_v61 = vpop.eup %1410 }
 0x35f   :  { %232 = vrot.lane.b32.xlu2 %v1411_v61, %s1532_s23 }
 0x360   :  { %v1413_v63 = vpop.eup %1412 }
 0x361   :  { %v209_v0 = vadd.f32 1.0, %v1413_v63 }
 0x363   :  { %1414 = vrcp.f32 %v209_v0  ;;  %v221_v6 = vand.u32 2147483648, %v209_v0  ;;  %vm215_vm9 = vweird.f32 %v209_v0  ;;  %v219_v7 = vand.u32 2147483647, %v209_v0 }
 0x365   :  { %v222_v9 = vor.u32 1.1754944e-38, %v221_v6  ;;  %vm220_vm11 = vcmp.eq.f32.partialorder %v219_v7, 8.507059e+37 }
 0x369   :  { %v1415_v1 = vpop.eup %1414 }
 0x36a   :  { %v211_v2 = vmul.f32 %v1415_v1, %v209_v0  ;;  %vm216_vm8 = vweird.f32 %v1415_v1 }
 0x36b   :  { %vm217_vm10 = vmor %vm215_vm9, %vm216_vm8 }
 0x36c   :  { %v212_v3 = vsub.f32 1.0, %v211_v2 }
 0x36e   :  { %v213_v4 = vmul.f32 %v1415_v1, %v212_v3 }
 0x370   :  { %v214_v5 = vadd.f32 %v1415_v1, %v213_v4 }
 0x372   :  { %v218_v8 = vsel %vm217_vm10, %v1415_v1, %v214_v5 }
 0x373   :  { %v223_v11 = vsel %vm220_vm11, %v222_v9, %v218_v8 }
 0x374   :  { %v230_v14 = vmul.f32 %v228_v13, %v223_v11 }
 0x3b9   :  { %v233_v10 = vpop.permute.xlu2 %232 }
 0x3ba   :  { %v235_v12 = vmul.f32 %v233_v10, %v223_v11 }
 0x3bc   :  { %237 = vrot.lane.b32.xlu1 %v235_v12, %s1532_s23  ;;  %v384_v12 = vrot.slane %v1661_v27, 6 }
 0x3c4   :  { %258 = vrot.lane.b32.xlu1 %v171_v57, %s1534_s27 }
 0x42e   :  { %v238_v15 = vpop.permute.xlu1 %237 }
 0x42f   :  { %v240_v16 = vadd.f32 %v238_v15, %v230_v14 }
 0x431   :  { %v241_v17 = vsub.f32 %v240_v16, %v228_v13 }
 0x433   :  { %v243_v18 = vrot.slane %v241_v17, 6 }
 0x435   :  { %244 = vrot.lane.b32.xlu2 %v243_v18, %s1533_s24 }
 0x436   :  { %v259_v30 = vpop.permute.xlu1 %258 }
 0x48f   :  { %v245_v19 = vpop.permute.xlu2 %244 }
 0x490   :  { %v247_v20 = vmul.f32 %v245_v19, %v1672_v50 }
 0x492   :  { %v249_v21 = vrot.slane %v247_v20, 2 }
 0x494   :  { %v251_v22 = vadd.f32 %v249_v21, %v159_v52 }
 0x496   :  { %1416 = vtanh.f32 %v251_v22  ;;  %329 = vrot.lane.b32.xlu1 %v251_v22, %s1532_s23 }
 0x49c   :  { %v1417_v24 = vpop.eup %1416 }
 0x49d   :  { %254 = vrot.lane.b32.xlu0 %v1417_v24, %s1534_s27 }
 0x508   :  { %v330_v56 = vpop.permute.xlu1 %329 }
 0x50f   :  { %v255_v25 = vpop.permute.xlu0 %254 }
 0x510   :  { %v1694_v29 = vmul.f32 %v255_v25, %v223_v11 }
 0x512   :  { %v261_v31 = vsub.f32 %v1694_v29, %v259_v30 }
 0x514   :  { %v263_v32 = vrot.slane %v261_v31, 6 }
 0x516   :  { %264 = vrot.lane.b32.xlu2 %v263_v32, %s1534_s27 }
 0x570   :  { %v265_v33 = vpop.permute.xlu2 %264 }
 0x571   :  { %v267_v34 = vmul.f32 %v265_v33, %v1672_v50 }
 0x573   :  { %v269_v35 = vrot.slane %v267_v34, 2 }
 0x575   :  { %v271_v36 = vadd.f32 %v269_v35, %v171_v57 }
 0x577   :  { %1352 = vmatmul.msk.f32.vlgmr.msra.gmra.mxu2 %vm100_vm5, %v271_v36 }
 0x5fa   :  { %v305_v38 = vpop.f32.mrf.mxu2 }
 0x5fb   :  { %v306_v39 = vadd.f32 %v305_v38, %v283_v37 }
 0x5fd   :  { %1418 = vtanh.f32 %v306_v39  ;;  %v1353_v41 = vmul.f32 -1.442695, %v306_v39 }
 0x5ff   :  { %1420 = vpow2.f32 %v1353_v41 }
 0x603   :  { %v1419_v40 = vpop.eup %1418 }
 0x604   :  { %334 = vrot.lane.b32.xlu0 %v1419_v40, %s1532_s23 }
 0x605   :  { %v1421_v42 = vpop.eup %1420 }
 0x606   :  { %v311_v43 = vadd.f32 1.0, %v1421_v42 }
 0x608   :  { %1422 = vrcp.f32 %v311_v43  ;;  %v323_v49 = vand.u32 2147483648, %v311_v43  ;;  %vm317_vm13 = vweird.f32 %v311_v43  ;;  %v321_v28 = vand.u32 2147483647, %v311_v43 }
 0x60a   :  { %v324_v52 = vor.u32 1.1754944e-38, %v323_v49  ;;  %vm322_vm15 = vcmp.eq.f32.partialorder %v321_v28, 8.507059e+37 }
 0x60e   :  { %v1423_v44 = vpop.eup %1422 }
 0x60f   :  { %v313_v45 = vmul.f32 %v1423_v44, %v311_v43  ;;  %vm318_vm12 = vweird.f32 %v1423_v44 }
 0x610   :  { %vm319_vm14 = vmor %vm317_vm13, %vm318_vm12 }
 0x611   :  { %v314_v46 = vsub.f32 1.0, %v313_v45 }
 0x613   :  { %v315_v47 = vmul.f32 %v1423_v44, %v314_v46 }
 0x615   :  { %v316_v48 = vadd.f32 %v1423_v44, %v315_v47 }
 0x617   :  { %v320_v51 = vsel %vm319_vm14, %v1423_v44, %v316_v48 }
 0x618   :  { %v325_v54 = vsel %vm322_vm15, %v324_v52, %v320_v51 }
 0x619   :  { %v332_v57 = vmul.f32 %v330_v56, %v325_v54 }
 0x676   :  { %v335_v53 = vpop.permute.xlu0 %334 }
 0x677   :  { %v337_v55 = vmul.f32 %v335_v53, %v325_v54 }
 0x679   :  { %339 = vrot.lane.b32.xlu2 %v337_v55, %s1532_s23 }
 0x681   :  { %360 = vrot.lane.b32.xlu2 %v271_v36, %s1534_s27 }
 0x6d3   :  { %v340_v58 = vpop.permute.xlu2 %339 }
 0x6d4   :  { %v342_v59 = vadd.f32 %v340_v58, %v332_v57 }
 0x6d6   :  { %v343_v60 = vsub.f32 %v342_v59, %v330_v56 }
 0x6d8   :  { %v345_v61 = vrot.slane %v343_v60, 4 }
 0x6da   :  { %346 = vrot.lane.b32.xlu0 %v345_v61, %s1533_s24 }
 0x6db   :  { %v361_v5 = vpop.permute.xlu2 %360 }
 0x74c   :  { %v347_v62 = vpop.permute.xlu0 %346 }
 0x74d   :  { %v349_v63 = vmul.f32 %v347_v62, %v1672_v50 }
 0x74f   :  { %v351_v0 = vrot.slane %v349_v63, 4 }
 0x751   :  { %v353_v1 = vadd.f32 %v351_v0, %v251_v22 }
 0x753   :  { %1424 = vtanh.f32 %v353_v1  ;;  %430 = vrot.lane.b32.xlu2 %v353_v1, %s1532_s23 }
 0x759   :  { %v1425_v2 = vpop.eup %1424 }
 0x75a   :  { %356 = vrot.lane.b32.xlu1 %v1425_v2, %s1534_s27 }
 0x7ad   :  { %v431_v35 = vpop.permute.xlu2 %430 }
 0x7cc   :  { %v357_v3 = vpop.permute.xlu1 %356 }
 0x7cd   :  { %v1708_v4 = vmul.f32 %v357_v3, %v325_v54 }
 0x7cf   :  { %v363_v6 = vsub.f32 %v1708_v4, %v361_v5 }
 0x7d1   :  { %v365_v7 = vrot.slane %v363_v6, 4 }
 0x7d3   :  { %366 = vrot.lane.b32.xlu0 %v365_v7, %s1534_s27 }
 0x845   :  { %v367_v8 = vpop.permute.xlu0 %366 }
 0x846   :  { %v369_v9 = vmul.f32 %v367_v8, %v1672_v50 }
 0x848   :  { %v371_v10 = vrot.slane %v369_v9, 4 }
 0x84a   :  { %v373_v11 = vadd.f32 %v371_v10, %v271_v36 }
 0x84c   :  { %1354 = vmatmul.msk.f32.vlgmr.msra.gmra.mxu3 %vm100_vm5, %v373_v11 }
 0x8cf   :  { %v406_v13 = vpop.f32.mrf.mxu3 }
 0x8d0   :  { %v407_v14 = vadd.f32 %v406_v13, %v384_v12 }
 0x8d2   :  { %1426 = vtanh.f32 %v407_v14  ;;  %v1355_v16 = vmul.f32 -1.442695, %v407_v14 }
 0x8d4   :  { %1428 = vpow2.f32 %v1355_v16 }
 0x8d8   :  { %v1427_v15 = vpop.eup %1426 }
 0x8d9   :  { %435 = vrot.lane.b32.xlu1 %v1427_v15, %s1532_s23  ;;  %v1736_v15 = vld [vmem:[%s1939_s1 + $0x8] sm:$0xff] }
 0x8da   :  { %v1429_v17 = vpop.eup %1428 }
 0x8db   :  { %v412_v18 = vadd.f32 1.0, %v1429_v17 }
 0x8dd   :  { %1430 = vrcp.f32 %v412_v18  ;;  %v424_v25 = vand.u32 2147483648, %v412_v18  ;;  %vm418_vm2 = vweird.f32 %v412_v18  ;;  %v422_v27 = vand.u32 2147483647, %v412_v18 }
 0x8df   :  { %v425_v31 = vor.u32 1.1754944e-38, %v424_v25  ;;  %vm423_vm4 = vcmp.eq.f32.partialorder %v422_v27, 8.507059e+37 }
 0x8e3   :  { %v1431_v19 = vpop.eup %1430 }
 0x8e4   :  { %v414_v20 = vmul.f32 %v1431_v19, %v412_v18  ;;  %vm419_vm1 = vweird.f32 %v1431_v19 }
 0x8e5   :  { %vm420_vm3 = vmor %vm418_vm2, %vm419_vm1 }
 0x8e6   :  { %v415_v21 = vsub.f32 1.0, %v414_v20 }
 0x8e8   :  { %v416_v22 = vmul.f32 %v1431_v19, %v415_v21 }
 0x8ea   :  { %v417_v24 = vadd.f32 %v1431_v19, %v416_v22 }
 0x8ec   :  { %v421_v30 = vsel %vm420_vm3, %v1431_v19, %v417_v24 }
 0x8ed   :  { %v426_v33 = vsel %vm423_vm4, %v425_v31, %v421_v30  ;;  %v581_v31 = vrot.slane %v1657_v23, 2 }
 0x8ee   :  { %v433_v36 = vmul.f32 %v431_v35, %v426_v33 }
 0x94b   :  { %v436_v32 = vpop.permute.xlu1 %435 }
 0x94c   :  { %v438_v34 = vmul.f32 %v436_v32, %v426_v33 }
 0x94e   :  { %440 = vrot.lane.b32.xlu0 %v438_v34, %s1532_s23 }
 0x956   :  { %461 = vrot.lane.b32.xlu0 %v373_v11, %s1534_s27 }
 0x9c0   :  { %v441_v37 = vpop.permute.xlu0 %440 }
 0x9c1   :  { %v443_v38 = vadd.f32 %v441_v37, %v433_v36 }
 0x9c3   :  { %v444_v39 = vsub.f32 %v443_v38, %v431_v35 }
 0x9c5   :  { %v446_v40 = vrot.slane %v444_v39, 2 }
 0x9c7   :  { %447 = vrot.lane.b32.xlu1 %v446_v40, %s1533_s24 }
 0x9c8   :  { %v462_v48 = vpop.permute.xlu0 %461 }
 0xa39   :  { %v448_v41 = vpop.permute.xlu1 %447 }
 0xa3a   :  { %v450_v42 = vmul.f32 %v448_v41, %v1672_v50 }
 0xa3c   :  { %v452_v43 = vrot.slane %v450_v42, 6 }
 0xa3e   :  { %v454_v44 = vadd.f32 %v452_v43, %v353_v1 }
 0xa40   :  { %1432 = vtanh.f32 %v454_v44  ;;  %533 = vrot.lane.b32.xlu0 %v454_v44, %s1532_s23 }
 0xa46   :  { %v1433_v45 = vpop.eup %1432 }
 0xa47   :  { %457 = vrot.lane.b32.xlu2 %v1433_v45, %s1534_s27 }
 0xaa1   :  { %v458_v46 = vpop.permute.xlu2 %457 }
 0xaa2   :  { %v1722_v47 = vmul.f32 %v458_v46, %v426_v33 }
 0xaa4   :  { %v464_v49 = vsub.f32 %v1722_v47, %v462_v48 }
 0xaa6   :  { %v466_v28 = vrot.slane %v464_v49, 2 }
 0xaa8   :  { %467 = vrot.lane.b32.xlu1 %v466_v28, %s1534_s27 }
 0xab2   :  { %v534_v10 = vpop.permute.xlu0 %533 }
 0xb1a   :  { %v468_v51 = vpop.permute.xlu1 %467 }
 0xb1b   :  { %v470_v52 = vmul.f32 %v468_v51, %v1672_v50 }
 0xb1d   :  { %v472_v53 = vrot.slane %v470_v52, 6 }
 0xb1f   :  { %v474_v54 = vadd.f32 %v472_v53, %v373_v11 }
 0xb21   :  { %1356 = vmatmul.msk.f32.vlgmr.msrb.gmra.mxu0 %vm100_vm5, %v474_v54 }
 0xb9e   :  { %v509_v55 = vpop.f32.mrf.mxu0 }
 0xb9f   :  { %v510_v56 = vadd.f32 %v509_v55, %v1659_v26 }
 0xba1   :  { %1434 = vtanh.f32 %v510_v56  ;;  %v1357_v58 = vmul.f32 -1.442695, %v510_v56 }
 0xba3   :  { %1436 = vpow2.f32 %v1357_v58 }
 0xba7   :  { %v1435_v57 = vpop.eup %1434 }
 0xba8   :  { %538 = vrot.lane.b32.xlu2 %v1435_v57, %s1532_s23 }
 0xba9   :  { %v1437_v59 = vpop.eup %1436 }
 0xbaa   :  { %v515_v60 = vadd.f32 1.0, %v1437_v59 }
 0xbac   :  { %1438 = vrcp.f32 %v515_v60  ;;  %v527_v2 = vand.u32 2147483648, %v515_v60  ;;  %vm521_vm9 = vweird.f32 %v515_v60  ;;  %v525_v3 = vand.u32 2147483647, %v515_v60 }
 0xbae   :  { %v528_v6 = vor.u32 1.1754944e-38, %v527_v2  ;;  %vm526_vm11 = vcmp.eq.f32.partialorder %v525_v3, 8.507059e+37 }
 0xbb2   :  { %v1439_v61 = vpop.eup %1438 }
 0xbb3   :  { %v517_v62 = vmul.f32 %v1439_v61, %v515_v60  ;;  %vm522_vm8 = vweird.f32 %v1439_v61 }
 0xbb4   :  { %vm523_vm10 = vmor %vm521_vm9, %vm522_vm8 }
 0xbb5   :  { %v518_v63 = vsub.f32 1.0, %v517_v62 }
 0xbb7   :  { %v519_v0 = vmul.f32 %v1439_v61, %v518_v63 }
 0xbb9   :  { %v520_v1 = vadd.f32 %v1439_v61, %v519_v0 }
 0xbbb   :  { %v524_v5 = vsel %vm523_vm10, %v1439_v61, %v520_v1 }
 0xbbc   :  { %v529_v8 = vsel %vm526_vm11, %v528_v6, %v524_v5 }
 0xbbd   :  { %v536_v11 = vmul.f32 %v534_v10, %v529_v8 }
 0xc02   :  { %v539_v7 = vpop.permute.xlu2 %538 }
 0xc03   :  { %v541_v9 = vmul.f32 %v539_v7, %v529_v8 }
 0xc05   :  { %543 = vrot.lane.b32.xlu1 %v541_v9, %s1532_s23 }
 0xc0d   :  { %560 = vrot.lane.b32.xlu1 %v474_v54, %s1534_s27 }
 0xc77   :  { %v544_v12 = vpop.permute.xlu1 %543 }
 0xc78   :  { %v546_v13 = vadd.f32 %v544_v12, %v536_v11 }
 0xc7a   :  { %v547_v14 = vsub.f32 %v546_v13, %v534_v10 }
 0xc7c   :  { %549 = vrot.lane.b32.xlu2 %v547_v14, %s1533_s24 }
 0xc7f   :  { %v561_v22 = vpop.permute.xlu1 %560 }
 0xcd6   :  { %v550_v16 = vpop.permute.xlu2 %549 }
 0xcd7   :  { %v552_v17 = vmul.f32 %v550_v16, %v1736_v15 }
 0xcd9   :  { %v553_v18 = vadd.f32 %v552_v17, %v454_v44 }
 0xcdb   :  { %1440 = vtanh.f32 %v553_v18  ;;  %627 = vrot.lane.b32.xlu1 %v553_v18, %s1532_s23 }
 0xce1   :  { %v1441_v19 = vpop.eup %1440 }
 0xce2   :  { %556 = vrot.lane.b32.xlu0 %v1441_v19, %s1534_s27 }
 0xd4d   :  { %v628_v51 = vpop.permute.xlu1 %627 }
 0xd54   :  { %v557_v20 = vpop.permute.xlu0 %556 }
 0xd55   :  { %v1741_v21 = vmul.f32 %v557_v20, %v529_v8  ;;  %v681_v8 = vrot.slane %v1659_v26, 4 }
 0xd57   :  { %v563_v24 = vsub.f32 %v1741_v21, %v561_v22 }
 0xd59   :  { %565 = vrot.lane.b32.xlu2 %v563_v24, %s1534_s27 }
 0xdb3   :  { %v566_v25 = vpop.permute.xlu2 %565 }
 0xdb4   :  { %v568_v27 = vmul.f32 %v566_v25, %v1736_v15 }
 0xdb6   :  { %v569_v30 = vadd.f32 %v568_v27, %v474_v54 }
 0xdb8   :  { %1358 = vmatmul.msk.f32.vlgmr.msrb.gmra.mxu1 %vm100_vm5, %v569_v30 }
 0xe35   :  { %v603_v32 = vpop.f32.mrf.mxu1 }
 0xe36   :  { %v604_v33 = vadd.f32 %v603_v32, %v581_v31 }
 0xe38   :  { %1442 = vtanh.f32 %v604_v33  ;;  %v1359_v35 = vmul.f32 -1.442695, %v604_v33 }
 0xe3a   :  { %1444 = vpow2.f32 %v1359_v35 }
 0xe3e   :  { %v1443_v34 = vpop.eup %1442 }
 0xe3f   :  { %632 = vrot.lane.b32.xlu0 %v1443_v34, %s1532_s23 }
 0xe40   :  { %v1445_v36 = vpop.eup %1444 }
 0xe41   :  { %v609_v37 = vadd.f32 1.0, %v1445_v36 }
 0xe43   :  { %1446 = vrcp.f32 %v609_v37  ;;  %v621_v43 = vand.u32 2147483648, %v609_v37  ;;  %vm615_vm13 = vweird.f32 %v609_v37  ;;  %v619_v44 = vand.u32 2147483647, %v609_v37 }
 0xe45   :  { %v622_v46 = vor.u32 1.1754944e-38, %v621_v43  ;;  %vm620_vm15 = vcmp.eq.f32.partialorder %v619_v44, 8.507059e+37 }
 0xe49   :  { %v1447_v38 = vpop.eup %1446 }
 0xe4a   :  { %v611_v39 = vmul.f32 %v1447_v38, %v609_v37  ;;  %vm616_vm12 = vweird.f32 %v1447_v38 }
 0xe4b   :  { %vm617_vm14 = vmor %vm615_vm13, %vm616_vm12  ;;  %vm874_vm12 = vcmask 195584   ;;  %vm278_vm13 = vcmask 125954  }
 0xe4c   :  { %v612_v40 = vsub.f32 1.0, %v611_v39 }
 0xe4e   :  { %v613_v41 = vmul.f32 %v1447_v38, %v612_v40 }
 0xe50   :  { %v614_v42 = vadd.f32 %v1447_v38, %v613_v41 }
 0xe52   :  { %v618_v45 = vsel %vm617_vm14, %v1447_v38, %v614_v42  ;;  %vm280_vm14 = vcmask 257154  }
 0xe53   :  { %v623_v49 = vsel %vm620_vm15, %v622_v46, %v618_v45  ;;  %vm380_vm15 = vcmask 128004  }
 0xe54   :  { %v630_v52 = vmul.f32 %v628_v51, %v623_v49 }
 0xeb1   :  { %v633_v48 = vpop.permute.xlu0 %632 }
 0xeb2   :  { %v635_v28 = vmul.f32 %v633_v48, %v623_v49 }
 0xeb4   :  { %637 = vrot.lane.b32.xlu2 %v635_v28, %s1532_s23 }
 0xebc   :  { %658 = vrot.lane.b32.xlu2 %v569_v30, %s1534_s27 }
 0xf0e   :  { %v638_v53 = vpop.permute.xlu2 %637 }
 0xf0f   :  { %v640_v54 = vadd.f32 %v638_v53, %v630_v52  ;;  %v780_v53 = vrot.slane %v1657_v23, 6 }
 0xf11   :  { %v641_v55 = vsub.f32 %v640_v54, %v628_v51 }
 0xf13   :  { %v643_v56 = vrot.slane %v641_v55, 6 }
 0xf15   :  { %644 = vrot.lane.b32.xlu0 %v643_v56, %s1533_s24 }
 0xf16   :  { %v659_v0 = vpop.permute.xlu2 %658 }
 0xf87   :  { %v645_v57 = vpop.permute.xlu0 %644 }
 0xf88   :  { %v647_v58 = vmul.f32 %v645_v57, %v1736_v15 }
 0xf8a   :  { %v649_v59 = vrot.slane %v647_v58, 2 }
 0xf8c   :  { %v651_v60 = vadd.f32 %v649_v59, %v553_v18 }
 0xf8e   :  { %1448 = vtanh.f32 %v651_v60  ;;  %727 = vrot.lane.b32.xlu2 %v651_v60, %s1532_s23 }
 0xf94   :  { %v1449_v61 = vpop.eup %1448 }
 0xf95   :  { %654 = vrot.lane.b32.xlu1 %v1449_v61, %s1534_s27 }
 0xfe8   :  { %v728_v32 = vpop.permute.xlu2 %727 }
0x1007   :  { %v655_v62 = vpop.permute.xlu1 %654 }
0x1008   :  { %v1755_v63 = vmul.f32 %v655_v62, %v623_v49 }
0x100a   :  { %v661_v1 = vsub.f32 %v1755_v63, %v659_v0 }
0x100c   :  { %v663_v2 = vrot.slane %v661_v1, 6 }
0x100e   :  { %664 = vrot.lane.b32.xlu0 %v663_v2, %s1534_s27 }
0x1080   :  { %v665_v3 = vpop.permute.xlu0 %664 }
0x1081   :  { %v667_v5 = vmul.f32 %v665_v3, %v1736_v15 }
0x1083   :  { %v669_v6 = vrot.slane %v667_v5, 2 }
0x1085   :  { %v671_v7 = vadd.f32 %v669_v6, %v569_v30 }
0x1087   :  { %1360 = vmatmul.msk.f32.vlgmr.msrb.gmra.mxu2 %vm100_vm5, %v671_v7 }
0x110a   :  { %v703_v9 = vpop.f32.mrf.mxu2 }
0x110b   :  { %v704_v10 = vadd.f32 %v703_v9, %v681_v8  ;;  %v273_v9 = vrot.slane %v1694_v29, 6  ;;  %v867_v29 = vld [vmem:[%s1940_s2] sm:$0xff] }
0x110d   :  { %1450 = vtanh.f32 %v704_v10  ;;  %v1361_v12 = vmul.f32 -1.442695, %v704_v10  ;;  %v871_v10 = vld [vmem:[%s1942_s4 + $0x10] sm:$0xff] }
0x110e   :  { %894 = vmatpush.msra.mxu0 %v871_v10 }
0x110f   :  { %1452 = vpow2.f32 %v1361_v12  ;;  %v869_v12 = vld [vmem:[%s1942_s4] sm:$0xff] }
0x1113   :  { %v1451_v11 = vpop.eup %1450 }
0x1114   :  { %732 = vrot.lane.b32.xlu1 %v1451_v11, %s1532_s23  ;;  %v870_v11 = vld [vmem:[%s1942_s4 + $0x8] sm:$0xff] }
0x1115   :  { %v1453_v13 = vpop.eup %1452  ;;  %895 = vmatpush.msra.mxu0 %v870_v11  ;;  %v1105_v11 = vld [vmem:[%s1943_s5 + $0x48] sm:$0xff] }
0x1116   :  { %v709_v14 = vadd.f32 1.0, %v1453_v13  ;;  %1132 = vmatpush.msra.mxu3 %v1105_v11 }
0x1117   :  { %896 = vmatpush.msra.mxu0 %v869_v12  ;;  %v1104_v12 = vld [vmem:[%s1943_s5 + $0x30] sm:$0xff] }
0x1118   :  { %1454 = vrcp.f32 %v709_v14  ;;  %v721_v22 = vand.u32 2147483648, %v709_v14  ;;  %vm715_vm2 = vweird.f32 %v709_v14  ;;  %v719_v26 = vand.u32 2147483647, %v709_v14  ;;  %1364 = vmatmul.msk.f32.vlgmr.msra.gmra.mxu0 %vm874_vm12, %v867_v29  ;;  %v1103_v29 = vld [vmem:[%s1943_s5 + $0x18] sm:$0xff]  ;;  %1133 = vmatpush.msra.mxu3 %v1104_v12 }
0x1119   :  { %v1535_v12 = vmov 0  }
0x111a   :  { %v722_v25 = vor.u32 1.1754944e-38, %v721_v22  ;;  %vm720_vm4 = vcmp.eq.f32.partialorder %v719_v26, 8.507059e+37  ;;  %v375_v26 = vrot.slane %v1708_v4, 4  ;;  %1134 = vmatpush.msra.mxu3 %v1103_v29  ;;  %1395 = vset.pattern.permute.xlu1 %v1535_v12 }
0x111b   :  { %1394 = vset.pattern.permute.xlu2 %v1535_v12  ;;  %1396 = vset.pattern.permute.xlu0 %v1535_v12 }
0x111e   :  { %v1455_v16 = vpop.eup %1454 }
0x111f   :  { %v711_v17 = vmul.f32 %v1455_v16, %v709_v14  ;;  %vm716_vm1 = vweird.f32 %v1455_v16 }
0x1120   :  { %vm717_vm3 = vmor %vm715_vm2, %vm716_vm1  ;;  %vm382_vm1 = vcmask 259204   ;;  %vm481_vm2 = vcmask 130054  }
0x1121   :  { %v712_v18 = vsub.f32 1.0, %v711_v17  ;;  %v868_v17 = vld [vmem:[%s1940_s2 + $0x8] sm:$0xff] }
0x1122   :  { %1365 = vmatmul.msk.f32.gmra.mxu0 %vm874_vm12, %v868_v17 }
0x1123   :  { %v713_v19 = vmul.f32 %v1455_v16, %v712_v18 }
0x1125   :  { %v714_v20 = vadd.f32 %v1455_v16, %v713_v19 }
0x1127   :  { %v718_v24 = vsel %vm717_vm3, %v1455_v16, %v714_v20  ;;  %vm483_vm3 = vcmask 261254  }
0x1128   :  { %v723_v30 = vsel %vm720_vm4, %v722_v25, %v718_v24  ;;  %v673_v24 = vrot.slane %v1755_v63, 6 }
0x1129   :  { %v730_v33 = vmul.f32 %v728_v32, %v723_v30 }
0x1186   :  { %v733_v27 = vpop.permute.xlu1 %732 }
0x1187   :  { %v735_v31 = vmul.f32 %v733_v27, %v723_v30 }
0x1189   :  { %737 = vrot.lane.b32.xlu0 %v735_v31, %s1532_s23 }
0x1191   :  { %758 = vrot.lane.b32.xlu0 %v671_v7, %s1534_s27 }
0x11fb   :  { %v738_v34 = vpop.permute.xlu0 %737 }
0x11fc   :  { %v740_v35 = vadd.f32 %v738_v34, %v730_v33 }
0x11fe   :  { %v741_v36 = vsub.f32 %v740_v35, %v728_v32  ;;  %v476_v35 = vrot.slane %v1722_v47, 2 }
0x1200   :  { %v743_v37 = vrot.slane %v741_v36, 4  ;;  %v898_v36 = vpop.f32.mrf.mxu0 }
0x1202   :  { %744 = vrot.lane.b32.xlu1 %v743_v37, %s1533_s24 }
0x1203   :  { %v759_v45 = vpop.permute.xlu0 %758 }
0x1274   :  { %v745_v38 = vpop.permute.xlu1 %744 }
0x1275   :  { %v747_v39 = vmul.f32 %v745_v38, %v1736_v15  ;;  %v1399_v38 = vld [vmem:[%s1944_s6 + $0x2] ss:$0 sm:$0xff] }
0x1277   :  { %v749_v40 = vrot.slane %v747_v39, 4  ;;  %v901_v39 = vpop.f32.mrf.mxu0 }
0x1279   :  { %v1767_v41 = vadd.f32 %v749_v40, %v651_v60  ;;  %v902_v40 = vadd.f32 %v1399_v38, %v901_v39 }
0x127b   :  { %1456 = vtanh.f32 %v1767_v41  ;;  %826 = vrot.lane.b32.xlu0 %v1767_v41, %s1532_s23  ;;  %1093 = vmatpush.msra.mxu2 %v902_v40 }
0x1281   :  { %v1457_v42 = vpop.eup %1456 }
0x1282   :  { %754 = vrot.lane.b32.xlu2 %v1457_v42, %s1534_s27  ;;  %v905_v42 = vmul.f32 %v902_v40, %v902_v40 }
0x1284   :  { %v909_v47 = vsel %vm100_vm5, %v905_v42, 0.0 }
0x12dc   :  { %v755_v43 = vpop.permute.xlu2 %754 }
0x12dd   :  { %v1773_v44 = vmul.f32 %v755_v43, %v723_v30 }
0x12df   :  { %v761_v46 = vsub.f32 %v1773_v44, %v759_v45  ;;  %v773_v37 = vrot.slane %v1773_v44, 4 }
0x12e1   :  { %v763_v48 = vrot.slane %v761_v46, 4 }
0x12e3   :  { %764 = vrot.lane.b32.xlu1 %v763_v48, %s1534_s27 }
0x1355   :  { %v765_v49 = vpop.permute.xlu1 %764 }
0x1356   :  { %v767_v28 = vmul.f32 %v765_v49, %v1736_v15 }
0x1358   :  { %v769_v51 = vrot.slane %v767_v28, 4 }
0x135a   :  { %v771_v52 = vadd.f32 %v769_v51, %v671_v7 }
0x135c   :  { %1362 = vmatmul.msk.f32.vlgmr.msrb.gmra.mxu3 %vm100_vm5, %v771_v52 }
0x13df   :  { %v802_v54 = vpop.f32.mrf.mxu3 }
0x13e0   :  { %v803_v55 = vadd.f32 %v802_v54, %v780_v53 }
0x13e2   :  { %1458 = vtanh.f32 %v803_v55  ;;  %v1363_v57 = vmul.f32 -1.442695, %v803_v55 }
0x13e4   :  { %1460 = vpow2.f32 %v1363_v57 }
0x13e8   :  { %v1459_v56 = vpop.eup %1458 }
0x13e9   :  { %831 = vrot.lane.b32.xlu2 %v1459_v56, %s1532_s23 }
0x13ea   :  { %v1461_v58 = vpop.eup %1460 }
0x13eb   :  { %v808_v59 = vadd.f32 1.0, %v1461_v58 }
0x13ed   :  { %1462 = vrcp.f32 %v808_v59  ;;  %v820_v2 = vand.u32 2147483648, %v808_v59  ;;  %vm814_vm9 = vweird.f32 %v808_v59  ;;  %v818_v23 = vand.u32 2147483647, %v808_v59 }
0x13ef   :  { %v821_v5 = vor.u32 1.1754944e-38, %v820_v2  ;;  %vm819_vm11 = vcmp.eq.f32.partialorder %v818_v23, 8.507059e+37 }
0x13f3   :  { %v1463_v60 = vpop.eup %1462 }
0x13f4   :  { %v810_v61 = vmul.f32 %v1463_v60, %v808_v59  ;;  %vm815_vm8 = vweird.f32 %v1463_v60 }
0x13f5   :  { %vm816_vm10 = vmor %vm814_vm9, %vm815_vm8 }
0x13f6   :  { %v811_v62 = vsub.f32 1.0, %v810_v61 }
0x13f8   :  { %v812_v0 = vmul.f32 %v1463_v60, %v811_v62 }
0x13fa   :  { %v813_v1 = vadd.f32 %v1463_v60, %v812_v0 }
0x13fc   :  { %v817_v3 = vsel %vm816_vm10, %v1463_v60, %v813_v1 }
0x13fd   :  { %v1781_v7 = vsel %vm819_vm11, %v821_v5, %v817_v3 }
0x1443   :  { %v832_v6 = vpop.permute.xlu2 %831 }
0x1444   :  { %v834_v8 = vmul.f32 %v832_v6, %v1781_v7 }
0x1446   :  { %836 = vrot.lane.b32.xlu1 %v834_v8, %s1532_s23  ;;  %s1540_s23 = smov 8  }
0x144e   :  { %274 = vrot.lane.b32.xlu1 %v273_v9, %s1534_s27 }
0x1456   :  { %571 = vrot.lane.b32.xlu1 %v1741_v21, %s1534_s27  ;;  %v827_v21 = vpop.permute.xlu0 %826 }
0x1457   :  { %v829_v13 = vmul.f32 %v827_v21, %v1781_v7 }
0x14b8   :  { %v837_v14 = vpop.permute.xlu1 %836 }
0x14b9   :  { %v839_v16 = vadd.f32 %v837_v14, %v829_v13 }
0x14bb   :  { %v840_v18 = vsub.f32 %v839_v16, %v827_v21  ;;  %v1102_v21 = vld [vmem:[%s1943_s5] sm:$0xff] }
0x14bc   :  { %1135 = vmatpush.msra.mxu3 %v1102_v21 }
0x14bd   :  { %v842_v19 = vrot.slane %v840_v18, 2 }
0x14bf   :  { %843 = vrot.lane.b32.xlu2 %v842_v19, %s1533_s24 }
0x14c0   :  { %v275_v20 = vpop.permute.xlu1 %274 }
0x14c1   :  { %v277_v22 = vmul.f32 %v275_v20, %v1672_v50 }
0x14c3   :  { %279 = vst.msk [vmem:[#allocation2] sm:$0xc] %vm278_vm13, %v277_v22 }
0x14c4   :  { %281 = vst.msk [vmem:[#allocation2 + $0xa] sm:$0xc] %vm280_vm14, %v277_v22 }
0x14c7   :  { %376 = vrot.lane.b32.xlu2 %v375_v26, %s1534_s27  ;;  %v1868_v26 = vld [vmem:[%s1939_s1] sm:$0xff] }
0x14c8   :  { %v572_v49 = vpop.permute.xlu1 %571 }
0x14c9   :  { %v574_v52 = vmul.f32 %v572_v49, %v1736_v15 }
0x14cf   :  { %674 = vrot.lane.b32.xlu2 %v673_v24, %s1534_s27 }
0x14f8   :  { %910 = vadd.xlane.f32.xlu2 %v909_v47 }
0x1519   :  { %v844_v25 = vpop.permute.xlu2 %843 }
0x151a   :  { %v846_v27 = vmul.f32 %v844_v25, %v1736_v15 }
0x151c   :  { %v848_v30 = vrot.slane %v846_v27, 6 }
0x151e   :  { %v850_v31 = vadd.f32 %v848_v30, %v1767_v41  ;;  %v899_v41 = vadd.f32 %v1399_v38, %v898_v36 }
0x1520   :  { %1464 = vtanh.f32 %v850_v31  ;;  %1094 = vmatpush.msra.mxu2 %v899_v41  ;;  %v904_v43 = vmul.f32 %v899_v41, %v899_v41 }
0x1521   :  { %v377_v32 = vpop.permute.xlu2 %376 }
0x1522   :  { %v379_v33 = vmul.f32 %v377_v32, %v1672_v50  ;;  %v906_v45 = vsel %vm100_vm5, %v904_v43, 0.0 }
0x1524   :  { %381 = vst.msk [vmem:[#allocation2] sm:$0x30] %vm380_vm15, %v379_v33 }
0x1525   :  { %383 = vst.msk [vmem:[#allocation2 + $0x6] sm:$0x30] %vm382_vm1, %v379_v33 }
0x1526   :  { %v1465_v4 = vpop.eup %1464 }
0x1527   :  { %853 = vrot.lane.b32.xlu0 %v1465_v4, %s1534_s27 }
0x1529   :  { %v675_v63 = vpop.permute.xlu2 %674 }
0x152a   :  { %v677_v34 = vmul.f32 %v675_v63, %v1736_v15 }
0x152c   :  { %678 = vst.msk [vmem:[#allocation2 + $0x8] sm:$0xc] %vm278_vm13, %v677_v34 }
0x152d   :  { %679 = vst.msk [vmem:[#allocation2 + $0x2] sm:$0xc] %vm280_vm14, %v677_v34 }
0x152f   :  { %477 = vrot.lane.b32.xlu0 %v476_v35, %s1534_s27 }
0x1537   :  { %774 = vrot.lane.b32.xlu0 %v773_v37, %s1534_s27 }
0x1561   :  { %907 = vadd.xlane.f32.xlu0 %v906_v45 }
0x156b   :  { %v911_v55 = vpop.xlane.xlu2 %910 }
0x156c   :  { %v913_v56 = vmax.f32 %v911_v55, 1e-24 }
0x156e   :  { %1466 = vrsqrt.f32 %v913_v56  ;;  %vm930_vm4 = vweird.f32 %v913_v56 }
0x1575   :  { %1009 = vrot.lane.b32.xlu0 %v1736_v15, %s1533_s24 }
0x1599   :  { %v854_v44 = vpop.permute.xlu0 %853 }
0x159a   :  { %v856_v46 = vmul.f32 %v854_v44, %v1781_v7 }
0x159c   :  { %v858_v48 = vrot.slane %v856_v46, 2 }
0x159e   :  { %859 = vrot.lane.b32.xlu1 %v858_v48, %s1534_s27 }
0x15a1   :  { %v478_v28 = vpop.permute.xlu0 %477 }
0x15a2   :  { %v480_v51 = vmul.f32 %v478_v28, %v1672_v50  ;;  %v1467_v50 = vpop.eup %1466 }
0x15a3   :  { %v925_v57 = vmul.f32 %v1467_v50, %v913_v56  ;;  %vm931_vm8 = vweird.f32 %v1467_v50 }
0x15a4   :  { %482 = vst.msk [vmem:[#allocation2] sm:$0xc0] %vm481_vm2, %v480_v51 }
0x15a5   :  { %484 = vst.msk [vmem:[#allocation2 + $0x2] sm:$0xc0] %vm483_vm3, %v480_v51  ;;  %v926_v58 = vmul.f32 %v1467_v50, %v925_v57 }
0x15a6   :  { %575 = vst.msk [vmem:[#allocation2 + $0x8] sm:$0x3] %vm173_vm6, %v574_v52  ;;  %vm932_vm6 = vmor %vm930_vm4, %vm931_vm8 }
0x15a7   :  { %576 = vst.msk [vmem:[#allocation2 + $0x6] sm:$0x3] %vm175_vm7, %v574_v52  ;;  %v927_v59 = vmul.f32 0.5, %v926_v58 }
0x15a9   :  { %v775_v53 = vpop.permute.xlu0 %774  ;;  %v928_v60 = vsub.f32 1.5, %v927_v59 }
0x15aa   :  { %v777_v54 = vmul.f32 %v775_v53, %v1736_v15 }
0x15ab   :  { %v929_v61 = vmul.f32 %v1467_v50, %v928_v60 }
0x15ac   :  { %778 = vst.msk [vmem:[#allocation2 + $0x8] sm:$0x30] %vm380_vm15, %v777_v54 }
0x15ad   :  { %779 = vst.msk [vmem:[#allocation2 - $0x2] sm:$0x30] %vm382_vm1, %v777_v54  ;;  %v933_v62 = vsel %vm932_vm6, %v1467_v50, %v929_v61 }
0x15ae   :  { %v935_v0 = vmul.f32 %v933_v62, %v902_v40 }
0x15b0   :  { %1366 = vmatpush.xpose.msk.msra.mxu1 %vm100_vm5, %v935_v0 }
0x15d4   :  { %v908_v1 = vpop.xlane.xlu0 %907 }
0x15d5   :  { %v912_v2 = vmax.f32 %v908_v1, 1e-24 }
0x15d7   :  { %1468 = vrsqrt.f32 %v912_v2  ;;  %vm920_vm7 = vweird.f32 %v912_v2 }
0x15dd   :  { %v1469_v23 = vpop.eup %1468 }
0x15de   :  { %v915_v3 = vmul.f32 %v1469_v23, %v912_v2  ;;  %vm921_vm9 = vweird.f32 %v1469_v23 }
0x15df   :  { %vm922_vm10 = vmor %vm920_vm7, %vm921_vm9 }
0x15e0   :  { %v916_v5 = vmul.f32 %v1469_v23, %v915_v3 }
0x15e2   :  { %v917_v6 = vmul.f32 0.5, %v916_v5 }
0x15e4   :  { %v918_v7 = vsub.f32 1.5, %v917_v6 }
0x15e6   :  { %v919_v8 = vmul.f32 %v1469_v23, %v918_v7 }
0x15e7   :  { %v1010_v28 = vpop.permute.xlu0 %1009 }
0x15e8   :  { %v923_v9 = vsel %vm922_vm10, %v1469_v23, %v919_v8 }
0x15e9   :  { %v934_v10 = vmul.f32 %v923_v9, %v899_v41 }
0x15eb   :  { %1367 = vmatpush.xpose.msk.msra.mxu1 %vm100_vm5, %v934_v10 }
0x1610   :  { %v860_v13 = vpop.permute.xlu1 %859 }
0x1611   :  { %v862_v14 = vmul.f32 %v860_v13, %v1736_v15 }
0x1613   :  { %863 = vst.msk [vmem:[#allocation2 + $0x8] sm:$0xc0] %vm481_vm2, %v862_v14 }
0x1614   :  { %864 = vst.msk [vmem:[#allocation2 - $0x6] sm:$0xc0] %vm483_vm3, %v862_v14 }
0x161a   :  { %v866_v16 = vld [vmem:[#allocation2 + $0x8] sm:$0xff] }
0x161b   :  { %v865_v17 = vld [vmem:[#allocation2] sm:$0xff]  ;;  %v937_v18 = vmul.f32 %v866_v16, %v866_v16 }
0x161c   :  { %1372 = vmatmul.msk.f32.vlgmr.msra.gmra.mxu3 %vm100_vm5, %v865_v17  ;;  %v936_v19 = vmul.f32 %v865_v17, %v865_v17 }
0x161d   :  { %v941_v20 = vsel %vm100_vm5, %v937_v18, 0.0 }
0x161e   :  { %942 = vadd.xlane.f32.xlu2 %v941_v20  ;;  %v938_v22 = vsel %vm100_vm5, %v936_v19, 0.0 }
0x161f   :  { %939 = vadd.xlane.f32.xlu1 %v938_v22 }
0x1624   :  { %1373 = vmatmul.msk.f32.gmra.mxu3 %vm100_vm5, %v866_v16 }
0x1636   :  { %1007 = vrot.lane.b32.xlu2 %v1868_v26, %s1533_s24 }
0x163e   :  { %1064 = vperm.xlu2 %1394, %v1868_v26   ;;  %v1109_v26 = vld [vmem:[%s1943_s5 + $0x50] sm:$0xff] }
0x163f   :  { %1163 = vmatpush.msrb.mxu0 %v1109_v26 }
0x1691   :  { %v943_v24 = vpop.xlane.xlu2 %942 }
0x1692   :  { %v945_v25 = vmax.f32 %v943_v24, 1e-24  ;;  %v940_v27 = vpop.xlane.xlu1 %939 }
0x1693   :  { %v944_v30 = vmax.f32 %v940_v27, 1e-24  ;;  %v1108_v27 = vld [vmem:[%s1943_s5 + $0x38] sm:$0xff] }
0x1694   :  { %1470 = vrsqrt.f32 %v945_v25  ;;  %vm962_vm15 = vweird.f32 %v945_v25  ;;  %1164 = vmatpush.msrb.mxu0 %v1108_v27 }
0x1695   :  { %1472 = vrsqrt.f32 %v944_v30  ;;  %vm952_vm12 = vweird.f32 %v944_v30 }
0x1699   :  { %v1008_v46 = vpop.permute.xlu2 %1007 }
0x169a   :  { %v1471_v31 = vpop.eup %1470 }
0x169b   :  { %v1473_v32 = vpop.eup %1472  ;;  %v957_v33 = vmul.f32 %v1471_v31, %v945_v25  ;;  %vm963_vm14 = vweird.f32 %v1471_v31 }
0x169c   :  { %v947_v4 = vmul.f32 %v1473_v32, %v944_v30  ;;  %vm953_vm11 = vweird.f32 %v1473_v32  ;;  %vm964_vm1 = vmor %vm962_vm15, %vm963_vm14  ;;  %v1107_v30 = vld [vmem:[%s1943_s5 + $0x20] sm:$0xff] }
0x169d   :  { %v958_v63 = vmul.f32 %v1471_v31, %v957_v33  ;;  %vm954_vm13 = vmor %vm952_vm12, %vm953_vm11  ;;  %1165 = vmatpush.msrb.mxu0 %v1107_v30 }
0x169e   :  { %v948_v34 = vmul.f32 %v1473_v32, %v947_v4 }
0x169f   :  { %v959_v35 = vmul.f32 0.5, %v958_v63 }
0x16a0   :  { %v949_v36 = vmul.f32 0.5, %v948_v34 }
0x16a1   :  { %v960_v38 = vsub.f32 1.5, %v959_v35  ;;  %v1065_v33 = vpop.permute.xlu2 %1064 }
0x16a2   :  { %v950_v37 = vsub.f32 1.5, %v949_v36 }
0x16a3   :  { %v961_v42 = vmul.f32 %v1471_v31, %v960_v38  ;;  %v1106_v38 = vld [vmem:[%s1943_s5 + $0x8] sm:$0xff] }
0x16a4   :  { %v951_v39 = vmul.f32 %v1473_v32, %v950_v37  ;;  %1166 = vmatpush.msrb.mxu0 %v1106_v38 }
0x16a5   :  { %v965_v47 = vsel %vm964_vm1, %v1471_v31, %v961_v42 }
0x16a6   :  { %v955_v40 = vsel %vm954_vm13, %v1473_v32, %v951_v39  ;;  %v967_v43 = vmul.f32 %v965_v47, %v866_v16  ;;  %vm1281_vm13 = vcmask 212096  }
0x16a7   :  { %v966_v41 = vmul.f32 %v955_v40, %v865_v17 }
0x16a9   :  { %1368 = vmatmul.msk.f32.vlgmr.msra.gmra.mxu1 %vm100_vm5, %v966_v41  ;;  %v1400_v41 = vld [vmem:[%s1944_s6 + $0x3] ss:$0 sm:$0xff] }
0x16b1   :  { %1369 = vmatmul.msk.f32.gmra.mxu1 %vm100_vm5, %v967_v43 }
0x1726   :  { %v997_v45 = vpop.f32.mrf.mxu1 }
0x1727   :  { %v1003_v44 = vmax.f32 %v997_v45, 0.0 }
0x1729   :  { %v1013_v48 = vmul.f32 %v1008_v46, %v1003_v44 }
0x172b   :  { %v1015_v52 = vmul.f32 %v1013_v48, %v1013_v48 }
0x172d   :  { %v1017_v55 = vsel %vm41_vm0, %v1015_v52, 0.0  ;;  %v1137_v52 = vpop.f32.mrf.mxu3 }
0x172e   :  { %v1000_v49 = vpop.f32.mrf.mxu1 }
0x172f   :  { %v1004_v51 = vmax.f32 %v1000_v49, 0.0  ;;  %v1112_v49 = vld [vmem:[%s1943_s5 + $0x40] sm:$0xff] }
0x1731   :  { %v1014_v53 = vmul.f32 %v1010_v28, %v1004_v51  ;;  %v1110_v51 = vld [vmem:[%s1943_s5 + $0x10] sm:$0xff] }
0x1733   :  { %v1016_v54 = vmul.f32 %v1014_v53, %v1014_v53 }
0x1735   :  { %v1018_v56 = vsel %vm41_vm0, %v1016_v54, 0.0 }
0x1736   :  { %v1019_v50 = vadd.f32 %v1018_v56, %v1017_v55 }
0x1738   :  { %v1020_v57 = vrot.slane %v1019_v50, 4 }
0x173a   :  { %v1021_v58 = vadd.f32 %v1020_v57, %v1019_v50  ;;  %v1140_v57 = vpop.f32.mrf.mxu3 }
0x173c   :  { %v1022_v59 = vrot.slane %v1021_v58, 2 }
0x173e   :  { %v1023_v60 = vadd.f32 %v1022_v59, %v1021_v58 }
0x1740   :  { %v1024_v61 = vrot.slane %v1023_v60, 1 }
0x1742   :  { %v1025_v62 = vadd.f32 %v1024_v61, %v1023_v60  ;;  %v1401_v61 = vld [vmem:[%s1944_s6 + $0x4] ss:$0 sm:$0xff] }
0x1744   :  { %v1026_v0 = vmax.f32 %v1025_v62, 1e-24 }
0x1746   :  { %1474 = vrsqrt.f32 %v1026_v0  ;;  %vm1033_vm3 = vweird.f32 %v1026_v0 }
0x174c   :  { %v1475_v1 = vpop.eup %1474 }
0x174d   :  { %v1028_v2 = vmul.f32 %v1475_v1, %v1026_v0  ;;  %vm1034_vm2 = vweird.f32 %v1475_v1 }
0x174e   :  { %vm1035_vm4 = vmor %vm1033_vm3, %vm1034_vm2 }
0x174f   :  { %v1029_v23 = vmul.f32 %v1475_v1, %v1028_v2 }
0x1751   :  { %v1030_v3 = vmul.f32 0.5, %v1029_v23 }
0x1753   :  { %v1031_v5 = vsub.f32 1.5, %v1030_v3 }
0x1755   :  { %v1032_v6 = vmul.f32 %v1475_v1, %v1031_v5 }
0x1757   :  { %v1036_v7 = vsel %vm1035_vm4, %v1475_v1, %v1032_v6 }
0x1758   :  { %v1037_v8 = vmul.f32 %v1036_v7, %v1013_v48  ;;  %v1038_v10 = vmul.f32 %v1036_v7, %v1014_v53  ;;  %v1113_v48 = vld [vmem:[%s1943_s5 + $0x58] sm:$0xff] }
0x1759   :  { %1252 = vmatpush.msrb.mxu1 %v1113_v48 }
0x175a   :  { %v1039_v9 = vsel %vm41_vm0, %v1037_v8, -inf  ;;  %v1042_v11 = vsel %vm41_vm0, %v1038_v10, -inf }
0x175b   :  { %1040 = vmax.xlane.f32.xlu1 %v1039_v9  ;;  %1253 = vmatpush.msrb.mxu1 %v1112_v49 }
0x1763   :  { %1043 = vmax.xlane.f32.xlu1 %v1042_v11 }
0x17ce   :  { %v1041_v29 = vpop.xlane.xlu1 %1040 }
0x17cf   :  { %v1045_v21 = vsub.f32 %v1037_v8, %v1041_v29 }
0x17d1   :  { %v1047_v13 = vmul.f32 1.442695, %v1045_v21 }
0x17d3   :  { %1476 = vpow2.f32 %v1047_v13 }
0x17d6   :  { %v1044_v14 = vpop.xlane.xlu1 %1043 }
0x17d7   :  { %v1046_v16 = vsub.f32 %v1038_v10, %v1044_v14 }
0x17d9   :  { %v1477_v17 = vpop.eup %1476  ;;  %v1049_v18 = vmul.f32 1.442695, %v1046_v16 }
0x17da   :  { %v1051_v19 = vmul.f32 %v1477_v17, %v1008_v46 }
0x17db   :  { %1478 = vpow2.f32 %v1049_v18 }
0x17dc   :  { %v1053_v20 = vsel %vm41_vm0, %v1051_v19, 0.0 }
0x17dd   :  { %1054 = vadd.xlane.f32.xlu1 %v1053_v20 }
0x17e1   :  { %v1479_v22 = vpop.eup %1478 }
0x17e2   :  { %v1052_v24 = vmul.f32 %v1479_v22, %v1010_v28  ;;  %v1111_v28 = vld [vmem:[%s1943_s5 + $0x28] sm:$0xff]  ;;  %s1538_s5 = smov [#allocation3]  }
0x17e3   :  { %1254 = vmatpush.msrb.mxu1 %v1111_v28  ;;  %s1331_s6 = sshll.u32 %s1538_s5, 4  ;;  %s1332_s6 = int_to_ptr.vmem [resolvable:$true] %s1331_s6 }
0x17e4   :  { %v1056_v25 = vsel %vm41_vm0, %v1052_v24, 0.0 }
0x17e5   :  { %1057 = vadd.xlane.f32.xlu0 %v1056_v25  ;;  %1255 = vmatpush.msrb.mxu1 %v1110_v51 }
0x17f6   :  { %1068 = vperm.xlu1 %1395, %v1736_v15  }
0x17f9   :  { %1276 = vrot.lane.b32.xlu0 %v1401_v61, %s1536_s11 }
0x1850   :  { %v1055_v31 = vpop.xlane.xlu1 %1054 }
0x1851   :  { %1480 = vrcp.f32 %v1055_v31 }
0x1857   :  { %v1481_v32 = vpop.eup %1480 }
0x1858   :  { %v1061_v15 = vmul.f32 %v1481_v32, %v1051_v19  ;;  %v1058_v63 = vpop.xlane.xlu0 %1057 }
0x1859   :  { %1482 = vrcp.f32 %v1058_v63 }
0x185a   :  { %v1071_v4 = vmul.f32 %v1065_v33, %v1061_v15 }
0x185c   :  { %1370 = vmatmul.msk.f32.vlgmr.msra.gmra.mxu2 %vm41_vm0, %v1071_v4 }
0x185f   :  { %v1483_v34 = vpop.eup %1482 }
0x1860   :  { %v1062_v35 = vmul.f32 %v1483_v34, %v1052_v24 }
0x1868   :  { %v1069_v36 = vpop.permute.xlu1 %1068 }
0x1869   :  { %v1072_v37 = vmul.f32 %v1069_v36, %v1062_v35 }
0x186b   :  { %1371 = vmatmul.msk.f32.gmra.mxu2 %vm41_vm0, %v1072_v37  ;;  %v1277_v31 = vpop.permute.xlu0 %1276 }
0x18df   :  { %v1096_v39 = vpop.f32.mrf.mxu2 }
0x18e0   :  { %1374 = vmatmul.msk.f32.vlgmr.msrb.gmra.mxu0 %vm100_vm5, %v1096_v39 }
0x18ee   :  { %v1099_v40 = vpop.f32.mrf.mxu2 }
0x18ef   :  { %1375 = vmatmul.msk.f32.gmra.mxu0 %vm100_vm5, %v1099_v40 }
0x195d   :  { %v1168_v42 = vpop.f32.mrf.mxu0 }
0x195e   :  { %v1169_v47 = vadd.f32 %v1400_v41, %v1168_v42 }
0x1960   :  { %1176 = vrot.lane.b32.xlu2 %v1169_v47, %s1536_s11 }
0x196c   :  { %v1171_v43 = vpop.f32.mrf.mxu0 }
0x196d   :  { %v1172_v45 = vadd.f32 %v1400_v41, %v1171_v43 }
0x196f   :  { %1484 = vtanh.f32 %v1172_v45  ;;  %1178 = vrot.lane.b32.xlu2 %v1172_v45, %s1536_s11 }
0x1970   :  { %1486 = vtanh.f32 %v1169_v47 }
0x1975   :  { %v1485_v44 = vpop.eup %1484 }
0x1976   :  { %v1487_v46 = vpop.eup %1486  ;;  %1228 = vrot.lane.b32.xlu1 %v1485_v44, %s1537_s12 }
0x1977   :  { %1226 = vrot.lane.b32.xlu2 %v1487_v46, %s1537_s12 }
0x19ba   :  { %v1177_v53 = vpop.permute.xlu2 %1176 }
0x19bb   :  { %v1182_v54 = vsel %vm41_vm0, %v1137_v52, %v1177_v53 }
0x19bc   :  { %v1376_v55 = vmul.f32 -1.442695, %v1182_v54 }
0x19be   :  { %1488 = vpow2.f32 %v1376_v55 }
0x19c4   :  { %v1489_v56 = vpop.eup %1488 }
0x19c5   :  { %v1190_v50 = vadd.f32 1.0, %v1489_v56 }
0x19c7   :  { %1490 = vrcp.f32 %v1190_v50  ;;  %v1203_v2 = vand.u32 2147483648, %v1190_v50  ;;  %v1201_v3 = vand.u32 2147483647, %v1190_v50  ;;  %vm1197_vm6 = vweird.f32 %v1190_v50 }
0x19c9   :  { %v1179_v58 = vpop.permute.xlu2 %1178  ;;  %v1204_v8 = vor.u32 1.1754944e-38, %v1203_v2  ;;  %vm1202_vm7 = vcmp.eq.f32.partialorder %v1201_v3, 8.507059e+37 }
0x19ca   :  { %v1183_v59 = vsel %vm41_vm0, %v1140_v57, %v1179_v58 }
0x19cb   :  { %v1377_v60 = vmul.f32 -1.442695, %v1183_v59 }
0x19cd   :  { %v1491_v62 = vpop.eup %1490  ;;  %1492 = vpow2.f32 %v1377_v60 }
0x19ce   :  { %v1193_v0 = vmul.f32 %v1491_v62, %v1190_v50  ;;  %vm1198_vm8 = vweird.f32 %v1491_v62 }
0x19cf   :  { %vm1199_vm0 = vmor %vm1197_vm6, %vm1198_vm8 }
0x19d0   :  { %v1194_v1 = vsub.f32 1.0, %v1193_v0 }
0x19d1   :  { %v1227_v11 = vpop.permute.xlu2 %1226 }
0x19d2   :  { %v1195_v23 = vmul.f32 %v1491_v62, %v1194_v1 }
0x19d3   :  { %v1493_v5 = vpop.eup %1492 }
0x19d4   :  { %v1191_v6 = vadd.f32 1.0, %v1493_v5  ;;  %v1196_v7 = vadd.f32 %v1491_v62, %v1195_v23 }
0x19d6   :  { %1494 = vrcp.f32 %v1191_v6  ;;  %v1200_v9 = vsel %vm1199_vm0, %v1491_v62, %v1196_v7  ;;  %v1218_v16 = vand.u32 2147483648, %v1191_v6  ;;  %vm1212_vm10 = vweird.f32 %v1191_v6 }
0x19d7   :  { %v1205_v10 = vsel %vm1202_vm7, %v1204_v8, %v1200_v9  ;;  %v1216_v18 = vand.u32 2147483647, %v1191_v6 }
0x19d8   :  { %v1232_v12 = vmul.f32 %v1227_v11, %v1205_v10  ;;  %v1219_v20 = vor.u32 1.1754944e-38, %v1218_v16 }
0x19d9   :  { %vm1217_vm12 = vcmp.eq.f32.partialorder %v1216_v18, 8.507059e+37 }
0x19da   :  { %1378 = vmatmul.msk.f32.vlgmr.msrb.gmra.mxu1 %vm100_vm5, %v1232_v12 }
0x19dc   :  { %v1495_v29 = vpop.eup %1494 }
0x19dd   :  { %v1208_v21 = vmul.f32 %v1495_v29, %v1191_v6  ;;  %vm1213_vm9 = vweird.f32 %v1495_v29 }
0x19de   :  { %vm1214_vm11 = vmor %vm1212_vm10, %vm1213_vm9 }
0x19df   :  { %v1209_v13 = vsub.f32 1.0, %v1208_v21 }
0x19e1   :  { %v1210_v14 = vmul.f32 %v1495_v29, %v1209_v13 }
0x19e3   :  { %v1211_v17 = vadd.f32 %v1495_v29, %v1210_v14 }
0x19e5   :  { %v1215_v19 = vsel %vm1214_vm11, %v1495_v29, %v1211_v17 }
0x19e6   :  { %v1220_v22 = vsel %vm1217_vm12, %v1219_v20, %v1215_v19 }
0x19e8   :  { %v1229_v24 = vpop.permute.xlu1 %1228 }
0x19e9   :  { %v1233_v25 = vmul.f32 %v1229_v24, %v1220_v22 }
0x19eb   :  { %1379 = vmatmul.msk.f32.gmra.mxu1 %vm100_vm5, %v1233_v25  ;;  %vm1302_vm5 = vcmask 80896  }
0x1a57   :  { %v1257_v26 = vpop.f32.mrf.mxu1 }
0x1a58   :  { %1265 = vrot.lane.b32.xlu2 %v1257_v26, %s1536_s11 }
0x1a68   :  { %v1260_v27 = vpop.f32.mrf.mxu1 }
0x1a69   :  { %1267 = vrot.lane.b32.xlu1 %v1260_v27, %s1536_s11 }
0x1ab2   :  { %v1266_v30 = vpop.permute.xlu2 %1265 }
0x1ab3   :  { %v1271_v32 = vadd.f32 %v1266_v30, %v1137_v52 }
0x1ab5   :  { %v1279_v33 = vadd.f32 %v1277_v31, %v1271_v32 }
0x1ab7   :  { %v1282_v15 = vsel %vm1281_vm13, %v1279_v33, -inf }
0x1ab8   :  { %1283 = vmax.xlane.f32.xlu2 %v1282_v15 }
0x1adb   :  { %v1268_v4 = vpop.permute.xlu1 %1267 }
0x1adc   :  { %v1272_v63 = vadd.f32 %v1268_v4, %v1140_v57 }
0x1ade   :  { %v1280_v34 = vadd.f32 %v1277_v31, %v1272_v63 }
0x1ae0   :  { %v1285_v35 = vsel %vm1281_vm13, %v1280_v34, -inf }
0x1ae1   :  { %1286 = vmax.xlane.f32.xlu1 %v1285_v35 }
0x1b2b   :  { %v1284_v36 = vpop.xlane.xlu2 %1283 }
0x1b2c   :  { %v1288_v37 = vsub.f32 %v1279_v33, %v1284_v36 }
0x1b2e   :  { %v1290_v38 = vmul.f32 1.442695, %v1288_v37 }
0x1b30   :  { %1496 = vpow2.f32 %v1290_v38 }
0x1b36   :  { %v1497_v39 = vpop.eup %1496 }
0x1b37   :  { %1296 = vrot.lane.b32.xlu0 %v1497_v39, %s1537_s12 }
0x1b54   :  { %v1287_v40 = vpop.xlane.xlu1 %1286 }
0x1b55   :  { %v1289_v41 = vsub.f32 %v1280_v34, %v1287_v40 }
0x1b57   :  { %v1292_v42 = vmul.f32 1.442695, %v1289_v41 }
0x1b59   :  { %1498 = vpow2.f32 %v1292_v42 }
0x1b5f   :  { %v1499_v47 = vpop.eup %1498 }
0x1b60   :  { %1298 = vrot.lane.b32.xlu0 %v1499_v47, %s1537_s12 }
0x1ba9   :  { %v1297_v43 = vpop.permute.xlu0 %1296 }
0x1baa   :  { %v1303_v45 = vsel %vm1302_vm5, %v1297_v43, 0.0 }
0x1bab   :  { %1304 = vadd.xlane.f32.xlu0 %v1303_v45 }
0x1bd2   :  { %v1299_v44 = vpop.permute.xlu0 %1298 }
0x1bd3   :  { %v1306_v46 = vsel %vm1302_vm5, %v1299_v44, 0.0 }
0x1bd4   :  { %1307 = vadd.xlane.f32.xlu2 %v1306_v46 }
0x1c1e   :  { %v1305_v48 = vpop.xlane.xlu0 %1304 }
0x1c1f   :  { %1500 = vlog2.f32 %v1305_v48 }
0x1c25   :  { %v1501_v49 = vpop.eup %1500 }
0x1c26   :  { %v1310_v28 = vmul.f32 0.6931472, %v1501_v49 }
0x1c28   :  { %v1313_v51 = vadd.f32 %v1310_v28, %v1284_v36 }
0x1c2a   :  { %v1315_v52 = vsub.f32 %v1279_v33, %v1313_v51 }
0x1c2c   :  { %1319 = vrot.lane.b32.xlu1 %v1315_v52, %s1537_s12 }
0x1c47   :  { %v1308_v53 = vpop.xlane.xlu2 %1307 }
0x1c48   :  { %1502 = vlog2.f32 %v1308_v53 }
0x1c4e   :  { %v1503_v54 = vpop.eup %1502 }
0x1c4f   :  { %v1312_v55 = vmul.f32 0.6931472, %v1503_v54 }
0x1c51   :  { %v1314_v56 = vadd.f32 %v1312_v55, %v1287_v40 }
0x1c53   :  { %v1316_v50 = vsub.f32 %v1280_v34, %v1314_v56 }
0x1c55   :  { %1321 = vrot.lane.b32.xlu2 %v1316_v50, %s1537_s12 }
0x1c9e   :  { %v1320_v57 = vpop.permute.xlu1 %1319 }
0x1c9f   :  { %1325 = vst.msk [vmem:[#allocation3] sm:$0xff] %vm1302_vm5, %v1320_v57 }
0x1caf   :  { %v1322_v58 = vpop.permute.xlu2 %1321 }
0x1cb0   :  { %1326 = vst.msk [vmem:[#allocation3 + $0x8] sm:$0xff] %vm1302_vm5, %v1322_v58 }
0x1cb1   :  { %1339 = dma.vmem_to_hbm [thread:$0]  %s1332_s6, 256, %s1334_s21, [#allocation4], %s1539_s22, %s1539_s22, %s1540_s23  }
0x1cb2   :  { %1529 = dma.done.wait [#allocation4], 256  }
0x1cb3   :  { %1530 = vsyncadd [#allocation4], 4294967040 }
0x1cb4   :  { %1344 = vsyncpa [#allocation4], 1 }

</bundles_post_ra>
